<compile_context>
chip_gen: v5e
topology: v5e:2x2
jax: 0.10.0
libtpu: 0.0.40
codegen_flags: <defaults>
</compile_context>

<pallas_src>
import math
import jax
import jax.numpy as jnp
from jax.experimental import pallas as pl
from jax.experimental.pallas import tpu as pltpu

# Small, module-consistent sizes (d_model divisible by nhead).
SEQ = 8
BATCH = 2
D_MODEL = 32
NHEAD = 4
DIM_FF = 64
HEAD_DIM = D_MODEL // NHEAD
LN_EPS = 1e-5

# Contract dim 1 of lhs with dim 1 of rhs == x @ W^T, without transposing W
# inside the kernel.
_DN_T = (((1,), (1,)), ((), ()))


def _vmem():
    return pl.BlockSpec(memory_space=pltpu.MemorySpace.VMEM)


def _layer_norm(x, g, b):
    mu = jnp.mean(x, axis=-1, keepdims=True)
    var = jnp.mean((x - mu) ** 2, axis=-1, keepdims=True)
    return (x - mu) * jax.lax.rsqrt(var + LN_EPS) * g + b


# --------------- single fused kernel: whole encoder layer ---------------
def fused_encoder_kernel(src_ref, pos_ref, wqk_ref, bqk_ref, wv_ref, bv_ref,
                         wo_ref, bo_ref, g1_ref, be1_ref, w1_ref, b1_ref,
                         w2_ref, b2_ref, g2_ref, be2_ref,
                         out_ref, attnw_ref, attn_scr):
    # Rows are batch-major: row index = b * SEQ + s (per-batch rows contiguous).
    x = src_ref[...]                                   # (N, D)
    xq = x + pos_ref[...]                              # with_pos_embed (q == k)

    # Fused Q/K projection; 1/sqrt(head_dim) already folded into the Q half.
    qk = jax.lax.dot_general(xq, wqk_ref[...], _DN_T,
                             preferred_element_type=jnp.float32) + bqk_ref[...]
    v = jax.lax.dot_general(x, wv_ref[...], _DN_T,
                            preferred_element_type=jnp.float32) + bv_ref[...]
    q = qk[:, :D_MODEL]
    k = qk[:, D_MODEL:]

    # Scaled-dot-product attention, all heads/batches in-register/VMEM.
    inv_h = 1.0 / NHEAD
    for b in range(BATCH):                             # static, unrolled
        r0 = b * SEQ
        w_acc = jnp.zeros((SEQ, SEQ), jnp.float32)
        for h in range(NHEAD):                         # static, unrolled
            c0 = h * HEAD_DIM
            q_bh = q[r0:r0 + SEQ, c0:c0 + HEAD_DIM]    # (S, hd), pre-scaled
            k_bh = k[r0:r0 + SEQ, c0:c0 + HEAD_DIM]
            v_bh = v[r0:r0 + SEQ, c0:c0 + HEAD_DIM]
            s = jax.lax.dot_general(q_bh, k_bh, _DN_T,
                                    preferred_element_type=jnp.float32)  # (S,S)
            m = jnp.max(s, axis=-1, keepdims=True)
            p = jnp.exp(s - m)
            attn = p / jnp.sum(p, axis=-1, keepdims=True)
            o_bh = jnp.dot(attn, v_bh, preferred_element_type=jnp.float32)
            attn_scr[r0:r0 + SEQ, c0:c0 + HEAD_DIM] = o_bh   # heads packed in D
            w_acc = w_acc + attn * inv_h
        attnw_ref[b, :, :] = w_acc                     # head-averaged weights

    # out_proj + residual + norm1 + FFN(relu) + residual + norm2
    a = attn_scr[...]                                  # (N, D) merged heads
    proj = jax.lax.dot_general(a, wo_ref[...], _DN_T,
                               preferred_element_type=jnp.float32) + bo_ref[...]
    x1 = _layer_norm(x + proj, g1_ref[...], be1_ref[...])      # norm1
    hdn = jax.lax.dot_general(x1, w1_ref[...], _DN_T,
                              preferred_element_type=jnp.float32) + b1_ref[...]
    hdn = jnp.maximum(hdn, 0.0)                        # relu
    y = jax.lax.dot_general(hdn, w2_ref[...], _DN_T,
                            preferred_element_type=jnp.float32) + b2_ref[...]
    out_ref[...] = _layer_norm(x1 + y, g2_ref[...], be2_ref[...])   # norm2


def transformer_encoder_layer(src, pos, p):
    S, B, D = src.shape
    N = S * B

    # Layout plumbing (wrapper-side only): batch-major (B*S, D) slabs so that
    # per-batch rows are contiguous inside the kernel.
    src_bm = jnp.transpose(src, (1, 0, 2)).reshape(N, D)
    pos_bm = jnp.transpose(pos, (1, 0, 2)).reshape(N, D)

    # Parameter prep: fuse Q/K projections, fold attention scale into Q half.
    scale = 1.0 / math.sqrt(HEAD_DIM)
    wqk = jnp.concatenate([p["wq"] * scale, p["wk"]], axis=0)   # (2D, D)
    bqk = jnp.concatenate([p["bq"] * scale, p["bk"]], axis=1)   # (1, 2D)

    out_flat, attn_w = pl.pallas_call(
        fused_encoder_kernel,
        out_shape=(jax.ShapeDtypeStruct((N, D), jnp.float32),
                   jax.ShapeDtypeStruct((B, S, S), jnp.float32)),
        in_specs=[_vmem()] * 16,
        out_specs=(_vmem(), _vmem()),
        scratch_shapes=[pltpu.VMEM((N, D), jnp.float32)],
    )(src_bm, pos_bm, wqk, bqk, p["wv"], p["bv"], p["wo"], p["bo"],
      p["g1"], p["be1"], p["w1"], p["b1"], p["w2"], p["b2"],
      p["g2"], p["be2"])

    out = out_flat.reshape(B, S, D).transpose(1, 0, 2)   # back to (S, B, D)
    return out, attn_w


# ---------------- pure-JAX reference (for correctness check) ----------------
def reference(src, pos, p):
    S, B, D = src.shape
    x = src.reshape(-1, D)
    xq = (src + pos).reshape(-1, D)
    q = xq @ p["wq"].T + p["bq"]
    k = xq @ p["wk"].T + p["bk"]
    v = x @ p["wv"].T + p["bv"]

    def heads(t):
        return t.reshape(S, B, NHEAD, HEAD_DIM).transpose(1, 2, 0, 3)

    qh, kh, vh = heads(q), heads(k), heads(v)
    s = jnp.einsum("bhqd,bhkd->bhqk", qh, kh) / math.sqrt(HEAD_DIM)
    attn = jax.nn.softmax(s, axis=-1)
    o = jnp.einsum("bhqk,bhkd->bhqd", attn, vh)
    o = o.transpose(2, 0, 1, 3).reshape(-1, D)
    o = o @ p["wo"].T + p["bo"]

    def ln(t, g, b):
        mu = jnp.mean(t, axis=-1, keepdims=True)
        var = jnp.mean((t - mu) ** 2, axis=-1, keepdims=True)
        return (t - mu) * jax.lax.rsqrt(var + LN_EPS) * g + b

    xr = ln(x + o, p["g1"], p["be1"])
    ff = jnp.maximum(xr @ p["w1"].T + p["b1"], 0.0) @ p["w2"].T + p["b2"]
    out = ln(xr + ff, p["g2"], p["be2"])
    return out.reshape(S, B, D), jnp.mean(attn, axis=1)


def make_params(key):
    ks = jax.random.split(key, 8)
    scale = 0.05
    return {
        "wq": scale * jax.random.normal(ks[0], (D_MODEL, D_MODEL), jnp.float32),
        "wk": scale * jax.random.normal(ks[1], (D_MODEL, D_MODEL), jnp.float32),
        "wv": scale * jax.random.normal(ks[2], (D_MODEL, D_MODEL), jnp.float32),
        "bq": jnp.zeros((1, D_MODEL), jnp.float32),
        "bk": jnp.zeros((1, D_MODEL), jnp.float32),
        "bv": jnp.zeros((1, D_MODEL), jnp.float32),
        "wo": scale * jax.random.normal(ks[3], (D_MODEL, D_MODEL), jnp.float32),
        "bo": 0.01 * jnp.ones((1, D_MODEL), jnp.float32),
        "w1": scale * jax.random.normal(ks[4], (DIM_FF, D_MODEL), jnp.float32),
        "b1": 0.01 * jnp.ones((1, DIM_FF), jnp.float32),
        "w2": scale * jax.random.normal(ks[5], (D_MODEL, DIM_FF), jnp.float32),
        "b2": 0.01 * jnp.ones((1, D_MODEL), jnp.float32),
        "g1": jnp.ones((1, D_MODEL), jnp.float32),
        "be1": jnp.zeros((1, D_MODEL), jnp.float32),
        "g2": jnp.ones((1, D_MODEL), jnp.float32),
        "be2": jnp.zeros((1, D_MODEL), jnp.float32),
    }


if __name__ == "__main__":
    key = jax.random.PRNGKey(0)
    k1, k2, k3 = jax.random.split(key, 3)
    src = jax.random.normal(k1, (SEQ, BATCH, D_MODEL), jnp.float32)
    pos = jax.random.normal(k2, (SEQ, BATCH, D_MODEL), jnp.float32)
    params = make_params(k3)

    out, score = transformer_encoder_layer(src, pos, params)
    out = jax.block_until_ready(out)
    score = jax.block_until_ready(score)

    ref_out, ref_score = reference(src, pos, params)
    assert out.shape == (SEQ, BATCH, D_MODEL) and score.shape == (BATCH, SEQ, SEQ)
    assert jnp.allclose(out, ref_out, atol=1e-4, rtol=1e-4)
    assert jnp.allclose(score, ref_score, atol=1e-4, rtol=1e-4)

    # TODO(synk): dropout (train-mode) not implemented; eval-mode identity assumed.
    print("KERNEL_OK")
</pallas_src>

<mosaic_0001>
module attributes {stable_mosaic.version = 11 : i64} {
  func.func @fused_encoder_kernel(%arg0: memref<16x32xf32, #tpu.memory_space<vmem>>, %arg1: memref<16x32xf32, #tpu.memory_space<vmem>>, %arg2: memref<64x32xf32, #tpu.memory_space<vmem>>, %arg3: memref<1x64xf32, #tpu.memory_space<vmem>>, %arg4: memref<32x32xf32, #tpu.memory_space<vmem>>, %arg5: memref<1x32xf32, #tpu.memory_space<vmem>>, %arg6: memref<32x32xf32, #tpu.memory_space<vmem>>, %arg7: memref<1x32xf32, #tpu.memory_space<vmem>>, %arg8: memref<1x32xf32, #tpu.memory_space<vmem>>, %arg9: memref<1x32xf32, #tpu.memory_space<vmem>>, %arg10: memref<64x32xf32, #tpu.memory_space<vmem>>, %arg11: memref<1x64xf32, #tpu.memory_space<vmem>>, %arg12: memref<32x64xf32, #tpu.memory_space<vmem>>, %arg13: memref<1x32xf32, #tpu.memory_space<vmem>>, %arg14: memref<1x32xf32, #tpu.memory_space<vmem>>, %arg15: memref<1x32xf32, #tpu.memory_space<vmem>>, %arg16: memref<16x32xf32, #tpu.memory_space<vmem>>, %arg17: memref<2x8x8xf32, #tpu.memory_space<vmem>>, %arg18: memref<16x32xf32, #tpu.memory_space<vmem>>) attributes {dimension_semantics = [], scalar_prefetch = 0 : i64, scratch_operands = 1 : i64, tpu.core_type = #tpu.core_type<tc>} {
    %c0 = arith.constant 0 : index
    %c0_0 = arith.constant 0 : index
    %0 = vector.load %arg0[%c0, %c0_0] : memref<16x32xf32, #tpu.memory_space<vmem>>, vector<16x32xf32>
    %c0_1 = arith.constant 0 : index
    %c0_2 = arith.constant 0 : index
    %1 = vector.load %arg1[%c0_1, %c0_2] : memref<16x32xf32, #tpu.memory_space<vmem>>, vector<16x32xf32>
    %2 = arith.addf %0, %1 : vector<16x32xf32>
    %c0_3 = arith.constant 0 : index
    %c0_4 = arith.constant 0 : index
    %3 = vector.load %arg2[%c0_3, %c0_4] : memref<64x32xf32, #tpu.memory_space<vmem>>, vector<64x32xf32>
    %cst = arith.constant dense<0.000000e+00> : vector<16x64xf32>
    %4 = tpu.matmul %2, %3, %cst {dimension_numbers = #tpu.dot_dimension_numbers<[1], [1], [0], [0], [0, 0, 1, 0], [], []>} : vector<16x32xf32>, vector<64x32xf32>, vector<16x64xf32> -> vector<16x64xf32>
    %c0_5 = arith.constant 0 : index
    %c0_6 = arith.constant 0 : index
    %5 = vector.load %arg3[%c0_5, %c0_6] : memref<1x64xf32, #tpu.memory_space<vmem>>, vector<1x64xf32>
    %6 = vector.broadcast %5 : vector<1x64xf32> to vector<16x64xf32>
    %7 = arith.addf %4, %6 : vector<16x64xf32>
    %c0_7 = arith.constant 0 : index
    %c0_8 = arith.constant 0 : index
    %8 = vector.load %arg4[%c0_7, %c0_8] : memref<32x32xf32, #tpu.memory_space<vmem>>, vector<32x32xf32>
    %cst_9 = arith.constant dense<0.000000e+00> : vector<16x32xf32>
    %9 = tpu.matmul %0, %8, %cst_9 {dimension_numbers = #tpu.dot_dimension_numbers<[1], [1], [0], [0], [0, 0, 1, 0], [], []>} : vector<16x32xf32>, vector<32x32xf32>, vector<16x32xf32> -> vector<16x32xf32>
    %c0_10 = arith.constant 0 : index
    %c0_11 = arith.constant 0 : index
    %10 = vector.load %arg5[%c0_10, %c0_11] : memref<1x32xf32, #tpu.memory_space<vmem>>, vector<1x32xf32>
    %11 = vector.broadcast %10 : vector<1x32xf32> to vector<16x32xf32>
    %12 = arith.addf %9, %11 : vector<16x32xf32>
    %13 = vector.extract_strided_slice %7 {offsets = [0, 0], sizes = [16, 32], strides = [1, 1]} : vector<16x64xf32> to vector<16x32xf32>
    %14 = vector.extract_strided_slice %7 {offsets = [0, 32], sizes = [16, 32], strides = [1, 1]} : vector<16x64xf32> to vector<16x32xf32>
    %cst_12 = arith.constant 0.000000e+00 : f32
    %15 = vector.broadcast %cst_12 : f32 to vector<8x8xf32>
    %16 = vector.extract_strided_slice %13 {offsets = [0, 0], sizes = [8, 8], strides = [1, 1]} : vector<16x32xf32> to vector<8x8xf32>
    %17 = vector.extract_strided_slice %14 {offsets = [0, 0], sizes = [8, 8], strides = [1, 1]} : vector<16x32xf32> to vector<8x8xf32>
    %18 = vector.extract_strided_slice %12 {offsets = [0, 0], sizes = [8, 8], strides = [1, 1]} : vector<16x32xf32> to vector<8x8xf32>
    %cst_13 = arith.constant dense<0.000000e+00> : vector<8x8xf32>
    %19 = tpu.matmul %16, %17, %cst_13 {dimension_numbers = #tpu.dot_dimension_numbers<[1], [1], [0], [0], [0, 0, 1, 0], [], []>} : vector<8x8xf32>, vector<8x8xf32>, vector<8x8xf32> -> vector<8x8xf32>
    %cst_14 = arith.constant dense<0xFF800000> : vector<8xf32>
    %20 = vector.multi_reduction <maximumf>, %19, %cst_14 [1] : vector<8x8xf32> to vector<8xf32>
    %21 = vector.shape_cast %20 : vector<8xf32> to vector<8x1xf32>
    %22 = vector.broadcast %21 : vector<8x1xf32> to vector<8x8xf32>
    %23 = arith.subf %19, %22 : vector<8x8xf32>
    %24 = math.exp %23 : vector<8x8xf32>
    %cst_15 = arith.constant dense<0.000000e+00> : vector<8xf32>
    %25 = vector.multi_reduction <add>, %24, %cst_15 [1] : vector<8x8xf32> to vector<8xf32>
    %26 = vector.shape_cast %25 : vector<8xf32> to vector<8x1xf32>
    %27 = vector.broadcast %26 : vector<8x1xf32> to vector<8x8xf32>
    %28 = arith.divf %24, %27 : vector<8x8xf32>
    %cst_16 = arith.constant dense<0.000000e+00> : vector<8x8xf32>
    %29 = tpu.matmul %28, %18, %cst_16 {dimension_numbers = #tpu.dot_dimension_numbers<[1], [0], [0], [1], [0, 0, 1, 1], [], []>} : vector<8x8xf32>, vector<8x8xf32>, vector<8x8xf32> -> vector<8x8xf32>
    %c0_17 = arith.constant 0 : index
    %c0_18 = arith.constant 0 : index
    %30 = vector.load %arg18[%c0_17, %c0_18] : memref<16x32xf32, #tpu.memory_space<vmem>>, vector<8x8xf32>
    tpu.vector_store %arg18[%c0_17, %c0_18], %29 {strides = array<i32>} : memref<16x32xf32, #tpu.memory_space<vmem>>, vector<8x8xf32>,
    %cst_19 = arith.constant 2.500000e-01 : f32
    %31 = vector.broadcast %cst_19 : f32 to vector<8x8xf32>
    %32 = arith.mulf %28, %31 : vector<8x8xf32>
    %33 = arith.addf %15, %32 : vector<8x8xf32>
    %34 = vector.extract_strided_slice %13 {offsets = [0, 8], sizes = [8, 8], strides = [1, 1]} : vector<16x32xf32> to vector<8x8xf32>
    %35 = vector.extract_strided_slice %14 {offsets = [0, 8], sizes = [8, 8], strides = [1, 1]} : vector<16x32xf32> to vector<8x8xf32>
    %36 = vector.extract_strided_slice %12 {offsets = [0, 8], sizes = [8, 8], strides = [1, 1]} : vector<16x32xf32> to vector<8x8xf32>
    %cst_20 = arith.constant dense<0.000000e+00> : vector<8x8xf32>
    %37 = tpu.matmul %34, %35, %cst_20 {dimension_numbers = #tpu.dot_dimension_numbers<[1], [1], [0], [0], [0, 0, 1, 0], [], []>} : vector<8x8xf32>, vector<8x8xf32>, vector<8x8xf32> -> vector<8x8xf32>
    %cst_21 = arith.constant dense<0xFF800000> : vector<8xf32>
    %38 = vector.multi_reduction <maximumf>, %37, %cst_21 [1] : vector<8x8xf32> to vector<8xf32>
    %39 = vector.shape_cast %38 : vector<8xf32> to vector<8x1xf32>
    %40 = vector.broadcast %39 : vector<8x1xf32> to vector<8x8xf32>
    %41 = arith.subf %37, %40 : vector<8x8xf32>
    %42 = math.exp %41 : vector<8x8xf32>
    %cst_22 = arith.constant dense<0.000000e+00> : vector<8xf32>
    %43 = vector.multi_reduction <add>, %42, %cst_22 [1] : vector<8x8xf32> to vector<8xf32>
    %44 = vector.shape_cast %43 : vector<8xf32> to vector<8x1xf32>
    %45 = vector.broadcast %44 : vector<8x1xf32> to vector<8x8xf32>
    %46 = arith.divf %42, %45 : vector<8x8xf32>
    %cst_23 = arith.constant dense<0.000000e+00> : vector<8x8xf32>
    %47 = tpu.matmul %46, %36, %cst_23 {dimension_numbers = #tpu.dot_dimension_numbers<[1], [0], [0], [1], [0, 0, 1, 1], [], []>} : vector<8x8xf32>, vector<8x8xf32>, vector<8x8xf32> -> vector<8x8xf32>
    %c0_24 = arith.constant 0 : index
    %c8 = arith.constant 8 : index
    %48 = vector.load %arg18[%c0_24, %c8] : memref<16x32xf32, #tpu.memory_space<vmem>>, vector<8x8xf32>
    tpu.vector_store %arg18[%c0_24, %c8], %47 {strides = array<i32>} : memref<16x32xf32, #tpu.memory_space<vmem>>, vector<8x8xf32>,
    %cst_25 = arith.constant 2.500000e-01 : f32
    %49 = vector.broadcast %cst_25 : f32 to vector<8x8xf32>
    %50 = arith.mulf %46, %49 : vector<8x8xf32>
    %51 = arith.addf %33, %50 : vector<8x8xf32>
    %52 = vector.extract_strided_slice %13 {offsets = [0, 16], sizes = [8, 8], strides = [1, 1]} : vector<16x32xf32> to vector<8x8xf32>
    %53 = vector.extract_strided_slice %14 {offsets = [0, 16], sizes = [8, 8], strides = [1, 1]} : vector<16x32xf32> to vector<8x8xf32>
    %54 = vector.extract_strided_slice %12 {offsets = [0, 16], sizes = [8, 8], strides = [1, 1]} : vector<16x32xf32> to vector<8x8xf32>
    %cst_26 = arith.constant dense<0.000000e+00> : vector<8x8xf32>
    %55 = tpu.matmul %52, %53, %cst_26 {dimension_numbers = #tpu.dot_dimension_numbers<[1], [1], [0], [0], [0, 0, 1, 0], [], []>} : vector<8x8xf32>, vector<8x8xf32>, vector<8x8xf32> -> vector<8x8xf32>
    %cst_27 = arith.constant dense<0xFF800000> : vector<8xf32>
    %56 = vector.multi_reduction <maximumf>, %55, %cst_27 [1] : vector<8x8xf32> to vector<8xf32>
    %57 = vector.shape_cast %56 : vector<8xf32> to vector<8x1xf32>
    %58 = vector.broadcast %57 : vector<8x1xf32> to vector<8x8xf32>
    %59 = arith.subf %55, %58 : vector<8x8xf32>
    %60 = math.exp %59 : vector<8x8xf32>
    %cst_28 = arith.constant dense<0.000000e+00> : vector<8xf32>
    %61 = vector.multi_reduction <add>, %60, %cst_28 [1] : vector<8x8xf32> to vector<8xf32>
    %62 = vector.shape_cast %61 : vector<8xf32> to vector<8x1xf32>
    %63 = vector.broadcast %62 : vector<8x1xf32> to vector<8x8xf32>
    %64 = arith.divf %60, %63 : vector<8x8xf32>
    %cst_29 = arith.constant dense<0.000000e+00> : vector<8x8xf32>
    %65 = tpu.matmul %64, %54, %cst_29 {dimension_numbers = #tpu.dot_dimension_numbers<[1], [0], [0], [1], [0, 0, 1, 1], [], []>} : vector<8x8xf32>, vector<8x8xf32>, vector<8x8xf32> -> vector<8x8xf32>
    %c0_30 = arith.constant 0 : index
    %c16 = arith.constant 16 : index
    %66 = vector.load %arg18[%c0_30, %c16] : memref<16x32xf32, #tpu.memory_space<vmem>>, vector<8x8xf32>
    tpu.vector_store %arg18[%c0_30, %c16], %65 {strides = array<i32>} : memref<16x32xf32, #tpu.memory_space<vmem>>, vector<8x8xf32>,
    %cst_31 = arith.constant 2.500000e-01 : f32
    %67 = vector.broadcast %cst_31 : f32 to vector<8x8xf32>
    %68 = arith.mulf %64, %67 : vector<8x8xf32>
    %69 = arith.addf %51, %68 : vector<8x8xf32>
    %70 = vector.extract_strided_slice %13 {offsets = [0, 24], sizes = [8, 8], strides = [1, 1]} : vector<16x32xf32> to vector<8x8xf32>
    %71 = vector.extract_strided_slice %14 {offsets = [0, 24], sizes = [8, 8], strides = [1, 1]} : vector<16x32xf32> to vector<8x8xf32>
    %72 = vector.extract_strided_slice %12 {offsets = [0, 24], sizes = [8, 8], strides = [1, 1]} : vector<16x32xf32> to vector<8x8xf32>
    %cst_32 = arith.constant dense<0.000000e+00> : vector<8x8xf32>
    %73 = tpu.matmul %70, %71, %cst_32 {dimension_numbers = #tpu.dot_dimension_numbers<[1], [1], [0], [0], [0, 0, 1, 0], [], []>} : vector<8x8xf32>, vector<8x8xf32>, vector<8x8xf32> -> vector<8x8xf32>
    %cst_33 = arith.constant dense<0xFF800000> : vector<8xf32>
    %74 = vector.multi_reduction <maximumf>, %73, %cst_33 [1] : vector<8x8xf32> to vector<8xf32>
    %75 = vector.shape_cast %74 : vector<8xf32> to vector<8x1xf32>
    %76 = vector.broadcast %75 : vector<8x1xf32> to vector<8x8xf32>
    %77 = arith.subf %73, %76 : vector<8x8xf32>
    %78 = math.exp %77 : vector<8x8xf32>
    %cst_34 = arith.constant dense<0.000000e+00> : vector<8xf32>
    %79 = vector.multi_reduction <add>, %78, %cst_34 [1] : vector<8x8xf32> to vector<8xf32>
    %80 = vector.shape_cast %79 : vector<8xf32> to vector<8x1xf32>
    %81 = vector.broadcast %80 : vector<8x1xf32> to vector<8x8xf32>
    %82 = arith.divf %78, %81 : vector<8x8xf32>
    %cst_35 = arith.constant dense<0.000000e+00> : vector<8x8xf32>
    %83 = tpu.matmul %82, %72, %cst_35 {dimension_numbers = #tpu.dot_dimension_numbers<[1], [0], [0], [1], [0, 0, 1, 1], [], []>} : vector<8x8xf32>, vector<8x8xf32>, vector<8x8xf32> -> vector<8x8xf32>
    %c0_36 = arith.constant 0 : index
    %c24 = arith.constant 24 : index
    %84 = vector.load %arg18[%c0_36, %c24] : memref<16x32xf32, #tpu.memory_space<vmem>>, vector<8x8xf32>
    tpu.vector_store %arg18[%c0_36, %c24], %83 {strides = array<i32>} : memref<16x32xf32, #tpu.memory_space<vmem>>, vector<8x8xf32>,
    %cst_37 = arith.constant 2.500000e-01 : f32
    %85 = vector.broadcast %cst_37 : f32 to vector<8x8xf32>
    %86 = arith.mulf %82, %85 : vector<8x8xf32>
    %87 = arith.addf %69, %86 : vector<8x8xf32>
    %c0_38 = arith.constant 0 : index
    %c0_39 = arith.constant 0 : index
    %c0_40 = arith.constant 0 : index
    %88 = vector.load %arg17[%c0_38, %c0_39, %c0_40] : memref<2x8x8xf32, #tpu.memory_space<vmem>>, vector<1x8x8xf32>
    %89 = vector.shape_cast %88 : vector<1x8x8xf32> to vector<8x8xf32>
    %90 = vector.shape_cast %87 : vector<8x8xf32> to vector<1x8x8xf32>
    tpu.vector_store %arg17[%c0_38, %c0_39, %c0_40], %90 {strides = array<i32>} : memref<2x8x8xf32, #tpu.memory_space<vmem>>, vector<1x8x8xf32>,
    %cst_41 = arith.constant 0.000000e+00 : f32
    %91 = vector.broadcast %cst_41 : f32 to vector<8x8xf32>
    %92 = vector.extract_strided_slice %13 {offsets = [8, 0], sizes = [8, 8], strides = [1, 1]} : vector<16x32xf32> to vector<8x8xf32>
    %93 = vector.extract_strided_slice %14 {offsets = [8, 0], sizes = [8, 8], strides = [1, 1]} : vector<16x32xf32> to vector<8x8xf32>
    %94 = vector.extract_strided_slice %12 {offsets = [8, 0], sizes = [8, 8], strides = [1, 1]} : vector<16x32xf32> to vector<8x8xf32>
    %cst_42 = arith.constant dense<0.000000e+00> : vector<8x8xf32>
    %95 = tpu.matmul %92, %93, %cst_42 {dimension_numbers = #tpu.dot_dimension_numbers<[1], [1], [0], [0], [0, 0, 1, 0], [], []>} : vector<8x8xf32>, vector<8x8xf32>, vector<8x8xf32> -> vector<8x8xf32>
    %cst_43 = arith.constant dense<0xFF800000> : vector<8xf32>
    %96 = vector.multi_reduction <maximumf>, %95, %cst_43 [1] : vector<8x8xf32> to vector<8xf32>
    %97 = vector.shape_cast %96 : vector<8xf32> to vector<8x1xf32>
    %98 = vector.broadcast %97 : vector<8x1xf32> to vector<8x8xf32>
    %99 = arith.subf %95, %98 : vector<8x8xf32>
    %100 = math.exp %99 : vector<8x8xf32>
    %cst_44 = arith.constant dense<0.000000e+00> : vector<8xf32>
    %101 = vector.multi_reduction <add>, %100, %cst_44 [1] : vector<8x8xf32> to vector<8xf32>
    %102 = vector.shape_cast %101 : vector<8xf32> to vector<8x1xf32>
    %103 = vector.broadcast %102 : vector<8x1xf32> to vector<8x8xf32>
    %104 = arith.divf %100, %103 : vector<8x8xf32>
    %cst_45 = arith.constant dense<0.000000e+00> : vector<8x8xf32>
    %105 = tpu.matmul %104, %94, %cst_45 {dimension_numbers = #tpu.dot_dimension_numbers<[1], [0], [0], [1], [0, 0, 1, 1], [], []>} : vector<8x8xf32>, vector<8x8xf32>, vector<8x8xf32> -> vector<8x8xf32>
    %c8_46 = arith.constant 8 : index
    %c0_47 = arith.constant 0 : index
    %106 = vector.load %arg18[%c8_46, %c0_47] : memref<16x32xf32, #tpu.memory_space<vmem>>, vector<8x8xf32>
    tpu.vector_store %arg18[%c8_46, %c0_47], %105 {strides = array<i32>} : memref<16x32xf32, #tpu.memory_space<vmem>>, vector<8x8xf32>,
    %cst_48 = arith.constant 2.500000e-01 : f32
    %107 = vector.broadcast %cst_48 : f32 to vector<8x8xf32>
    %108 = arith.mulf %104, %107 : vector<8x8xf32>
    %109 = arith.addf %91, %108 : vector<8x8xf32>
    %110 = vector.extract_strided_slice %13 {offsets = [8, 8], sizes = [8, 8], strides = [1, 1]} : vector<16x32xf32> to vector<8x8xf32>
    %111 = vector.extract_strided_slice %14 {offsets = [8, 8], sizes = [8, 8], strides = [1, 1]} : vector<16x32xf32> to vector<8x8xf32>
    %112 = vector.extract_strided_slice %12 {offsets = [8, 8], sizes = [8, 8], strides = [1, 1]} : vector<16x32xf32> to vector<8x8xf32>
    %cst_49 = arith.constant dense<0.000000e+00> : vector<8x8xf32>
    %113 = tpu.matmul %110, %111, %cst_49 {dimension_numbers = #tpu.dot_dimension_numbers<[1], [1], [0], [0], [0, 0, 1, 0], [], []>} : vector<8x8xf32>, vector<8x8xf32>, vector<8x8xf32> -> vector<8x8xf32>
    %cst_50 = arith.constant dense<0xFF800000> : vector<8xf32>
    %114 = vector.multi_reduction <maximumf>, %113, %cst_50 [1] : vector<8x8xf32> to vector<8xf32>
    %115 = vector.shape_cast %114 : vector<8xf32> to vector<8x1xf32>
    %116 = vector.broadcast %115 : vector<8x1xf32> to vector<8x8xf32>
    %117 = arith.subf %113, %116 : vector<8x8xf32>
    %118 = math.exp %117 : vector<8x8xf32>
    %cst_51 = arith.constant dense<0.000000e+00> : vector<8xf32>
    %119 = vector.multi_reduction <add>, %118, %cst_51 [1] : vector<8x8xf32> to vector<8xf32>
    %120 = vector.shape_cast %119 : vector<8xf32> to vector<8x1xf32>
    %121 = vector.broadcast %120 : vector<8x1xf32> to vector<8x8xf32>
    %122 = arith.divf %118, %121 : vector<8x8xf32>
    %cst_52 = arith.constant dense<0.000000e+00> : vector<8x8xf32>
    %123 = tpu.matmul %122, %112, %cst_52 {dimension_numbers = #tpu.dot_dimension_numbers<[1], [0], [0], [1], [0, 0, 1, 1], [], []>} : vector<8x8xf32>, vector<8x8xf32>, vector<8x8xf32> -> vector<8x8xf32>
    %c8_53 = arith.constant 8 : index
    %c8_54 = arith.constant 8 : index
    %124 = vector.load %arg18[%c8_53, %c8_54] : memref<16x32xf32, #tpu.memory_space<vmem>>, vector<8x8xf32>
    tpu.vector_store %arg18[%c8_53, %c8_54], %123 {strides = array<i32>} : memref<16x32xf32, #tpu.memory_space<vmem>>, vector<8x8xf32>,
    %cst_55 = arith.constant 2.500000e-01 : f32
    %125 = vector.broadcast %cst_55 : f32 to vector<8x8xf32>
    %126 = arith.mulf %122, %125 : vector<8x8xf32>
    %127 = arith.addf %109, %126 : vector<8x8xf32>
    %128 = vector.extract_strided_slice %13 {offsets = [8, 16], sizes = [8, 8], strides = [1, 1]} : vector<16x32xf32> to vector<8x8xf32>
    %129 = vector.extract_strided_slice %14 {offsets = [8, 16], sizes = [8, 8], strides = [1, 1]} : vector<16x32xf32> to vector<8x8xf32>
    %130 = vector.extract_strided_slice %12 {offsets = [8, 16], sizes = [8, 8], strides = [1, 1]} : vector<16x32xf32> to vector<8x8xf32>
    %cst_56 = arith.constant dense<0.000000e+00> : vector<8x8xf32>
    %131 = tpu.matmul %128, %129, %cst_56 {dimension_numbers = #tpu.dot_dimension_numbers<[1], [1], [0], [0], [0, 0, 1, 0], [], []>} : vector<8x8xf32>, vector<8x8xf32>, vector<8x8xf32> -> vector<8x8xf32>
    %cst_57 = arith.constant dense<0xFF800000> : vector<8xf32>
    %132 = vector.multi_reduction <maximumf>, %131, %cst_57 [1] : vector<8x8xf32> to vector<8xf32>
    %133 = vector.shape_cast %132 : vector<8xf32> to vector<8x1xf32>
    %134 = vector.broadcast %133 : vector<8x1xf32> to vector<8x8xf32>
    %135 = arith.subf %131, %134 : vector<8x8xf32>
    %136 = math.exp %135 : vector<8x8xf32>
    %cst_58 = arith.constant dense<0.000000e+00> : vector<8xf32>
    %137 = vector.multi_reduction <add>, %136, %cst_58 [1] : vector<8x8xf32> to vector<8xf32>
    %138 = vector.shape_cast %137 : vector<8xf32> to vector<8x1xf32>
    %139 = vector.broadcast %138 : vector<8x1xf32> to vector<8x8xf32>
    %140 = arith.divf %136, %139 : vector<8x8xf32>
    %cst_59 = arith.constant dense<0.000000e+00> : vector<8x8xf32>
    %141 = tpu.matmul %140, %130, %cst_59 {dimension_numbers = #tpu.dot_dimension_numbers<[1], [0], [0], [1], [0, 0, 1, 1], [], []>} : vector<8x8xf32>, vector<8x8xf32>, vector<8x8xf32> -> vector<8x8xf32>
    %c8_60 = arith.constant 8 : index
    %c16_61 = arith.constant 16 : index
    %142 = vector.load %arg18[%c8_60, %c16_61] : memref<16x32xf32, #tpu.memory_space<vmem>>, vector<8x8xf32>
    tpu.vector_store %arg18[%c8_60, %c16_61], %141 {strides = array<i32>} : memref<16x32xf32, #tpu.memory_space<vmem>>, vector<8x8xf32>,
    %cst_62 = arith.constant 2.500000e-01 : f32
    %143 = vector.broadcast %cst_62 : f32 to vector<8x8xf32>
    %144 = arith.mulf %140, %143 : vector<8x8xf32>
    %145 = arith.addf %127, %144 : vector<8x8xf32>
    %146 = vector.extract_strided_slice %13 {offsets = [8, 24], sizes = [8, 8], strides = [1, 1]} : vector<16x32xf32> to vector<8x8xf32>
    %147 = vector.extract_strided_slice %14 {offsets = [8, 24], sizes = [8, 8], strides = [1, 1]} : vector<16x32xf32> to vector<8x8xf32>
    %148 = vector.extract_strided_slice %12 {offsets = [8, 24], sizes = [8, 8], strides = [1, 1]} : vector<16x32xf32> to vector<8x8xf32>
    %cst_63 = arith.constant dense<0.000000e+00> : vector<8x8xf32>
    %149 = tpu.matmul %146, %147, %cst_63 {dimension_numbers = #tpu.dot_dimension_numbers<[1], [1], [0], [0], [0, 0, 1, 0], [], []>} : vector<8x8xf32>, vector<8x8xf32>, vector<8x8xf32> -> vector<8x8xf32>
    %cst_64 = arith.constant dense<0xFF800000> : vector<8xf32>
    %150 = vector.multi_reduction <maximumf>, %149, %cst_64 [1] : vector<8x8xf32> to vector<8xf32>
    %151 = vector.shape_cast %150 : vector<8xf32> to vector<8x1xf32>
    %152 = vector.broadcast %151 : vector<8x1xf32> to vector<8x8xf32>
    %153 = arith.subf %149, %152 : vector<8x8xf32>
    %154 = math.exp %153 : vector<8x8xf32>
    %cst_65 = arith.constant dense<0.000000e+00> : vector<8xf32>
    %155 = vector.multi_reduction <add>, %154, %cst_65 [1] : vector<8x8xf32> to vector<8xf32>
    %156 = vector.shape_cast %155 : vector<8xf32> to vector<8x1xf32>
    %157 = vector.broadcast %156 : vector<8x1xf32> to vector<8x8xf32>
    %158 = arith.divf %154, %157 : vector<8x8xf32>
    %cst_66 = arith.constant dense<0.000000e+00> : vector<8x8xf32>
    %159 = tpu.matmul %158, %148, %cst_66 {dimension_numbers = #tpu.dot_dimension_numbers<[1], [0], [0], [1], [0, 0, 1, 1], [], []>} : vector<8x8xf32>, vector<8x8xf32>, vector<8x8xf32> -> vector<8x8xf32>
    %c8_67 = arith.constant 8 : index
    %c24_68 = arith.constant 24 : index
    %160 = vector.load %arg18[%c8_67, %c24_68] : memref<16x32xf32, #tpu.memory_space<vmem>>, vector<8x8xf32>
    tpu.vector_store %arg18[%c8_67, %c24_68], %159 {strides = array<i32>} : memref<16x32xf32, #tpu.memory_space<vmem>>, vector<8x8xf32>,
    %cst_69 = arith.constant 2.500000e-01 : f32
    %161 = vector.broadcast %cst_69 : f32 to vector<8x8xf32>
    %162 = arith.mulf %158, %161 : vector<8x8xf32>
    %163 = arith.addf %145, %162 : vector<8x8xf32>
    %c1 = arith.constant 1 : index
    %c0_70 = arith.constant 0 : index
    %c0_71 = arith.constant 0 : index
    %164 = vector.load %arg17[%c1, %c0_70, %c0_71] : memref<2x8x8xf32, #tpu.memory_space<vmem>>, vector<1x8x8xf32>
    %165 = vector.shape_cast %164 : vector<1x8x8xf32> to vector<8x8xf32>
    %166 = vector.shape_cast %163 : vector<8x8xf32> to vector<1x8x8xf32>
    tpu.vector_store %arg17[%c1, %c0_70, %c0_71], %166 {strides = array<i32>} : memref<2x8x8xf32, #tpu.memory_space<vmem>>, vector<1x8x8xf32>,
    %c0_72 = arith.constant 0 : index
    %c0_73 = arith.constant 0 : index
    %167 = vector.load %arg18[%c0_72, %c0_73] : memref<16x32xf32, #tpu.memory_space<vmem>>, vector<16x32xf32>
    %c0_74 = arith.constant 0 : index
    %c0_75 = arith.constant 0 : index
    %168 = vector.load %arg6[%c0_74, %c0_75] : memref<32x32xf32, #tpu.memory_space<vmem>>, vector<32x32xf32>
    %cst_76 = arith.constant dense<0.000000e+00> : vector<16x32xf32>
    %169 = tpu.matmul %167, %168, %cst_76 {dimension_numbers = #tpu.dot_dimension_numbers<[1], [1], [0], [0], [0, 0, 1, 0], [], []>} : vector<16x32xf32>, vector<32x32xf32>, vector<16x32xf32> -> vector<16x32xf32>
    %c0_77 = arith.constant 0 : index
    %c0_78 = arith.constant 0 : index
    %170 = vector.load %arg7[%c0_77, %c0_78] : memref<1x32xf32, #tpu.memory_space<vmem>>, vector<1x32xf32>
    %171 = vector.broadcast %170 : vector<1x32xf32> to vector<16x32xf32>
    %172 = arith.addf %169, %171 : vector<16x32xf32>
    %173 = arith.addf %0, %172 : vector<16x32xf32>
    %c0_79 = arith.constant 0 : index
    %c0_80 = arith.constant 0 : index
    %174 = vector.load %arg8[%c0_79, %c0_80] : memref<1x32xf32, #tpu.memory_space<vmem>>, vector<1x32xf32>
    %c0_81 = arith.constant 0 : index
    %c0_82 = arith.constant 0 : index
    %175 = vector.load %arg9[%c0_81, %c0_82] : memref<1x32xf32, #tpu.memory_space<vmem>>, vector<1x32xf32>
    %cst_83 = arith.constant dense<0.000000e+00> : vector<16xf32>
    %176 = vector.multi_reduction <add>, %173, %cst_83 [1] : vector<16x32xf32> to vector<16xf32>
    %177 = vector.shape_cast %176 : vector<16xf32> to vector<16x1xf32>
    %cst_84 = arith.constant 3.200000e+01 : f32
    %178 = vector.broadcast %cst_84 : f32 to vector<16x1xf32>
    %179 = arith.divf %177, %178 : vector<16x1xf32>
    %180 = vector.broadcast %179 : vector<16x1xf32> to vector<16x32xf32>
    %181 = arith.subf %173, %180 : vector<16x32xf32>
    %182 = arith.mulf %181, %181 : vector<16x32xf32>
    %cst_85 = arith.constant dense<0.000000e+00> : vector<16xf32>
    %183 = vector.multi_reduction <add>, %182, %cst_85 [1] : vector<16x32xf32> to vector<16xf32>
    %184 = vector.shape_cast %183 : vector<16xf32> to vector<16x1xf32>
    %cst_86 = arith.constant 3.200000e+01 : f32
    %185 = vector.broadcast %cst_86 : f32 to vector<16x1xf32>
    %186 = arith.divf %184, %185 : vector<16x1xf32>
    %187 = vector.broadcast %179 : vector<16x1xf32> to vector<16x32xf32>
    %188 = arith.subf %173, %187 : vector<16x32xf32>
    %cst_87 = arith.constant 9.99999974E-6 : f32
    %189 = vector.broadcast %cst_87 : f32 to vector<16x1xf32>
    %190 = arith.addf %186, %189 : vector<16x1xf32>
    %191 = math.rsqrt %190 : vector<16x1xf32>
    %192 = vector.broadcast %191 : vector<16x1xf32> to vector<16x32xf32>
    %193 = arith.mulf %188, %192 : vector<16x32xf32>
    %194 = vector.broadcast %174 : vector<1x32xf32> to vector<16x32xf32>
    %195 = arith.mulf %193, %194 : vector<16x32xf32>
    %196 = vector.broadcast %175 : vector<1x32xf32> to vector<16x32xf32>
    %197 = arith.addf %195, %196 : vector<16x32xf32>
    %c0_88 = arith.constant 0 : index
    %c0_89 = arith.constant 0 : index
    %198 = vector.load %arg10[%c0_88, %c0_89] : memref<64x32xf32, #tpu.memory_space<vmem>>, vector<64x32xf32>
    %cst_90 = arith.constant dense<0.000000e+00> : vector<16x64xf32>
    %199 = tpu.matmul %197, %198, %cst_90 {dimension_numbers = #tpu.dot_dimension_numbers<[1], [1], [0], [0], [0, 0, 1, 0], [], []>} : vector<16x32xf32>, vector<64x32xf32>, vector<16x64xf32> -> vector<16x64xf32>
    %c0_91 = arith.constant 0 : index
    %c0_92 = arith.constant 0 : index
    %200 = vector.load %arg11[%c0_91, %c0_92] : memref<1x64xf32, #tpu.memory_space<vmem>>, vector<1x64xf32>
    %201 = vector.broadcast %200 : vector<1x64xf32> to vector<16x64xf32>
    %202 = arith.addf %199, %201 : vector<16x64xf32>
    %cst_93 = arith.constant 0.000000e+00 : f32
    %203 = vector.broadcast %cst_93 : f32 to vector<16x64xf32>
    %204 = arith.maximumf %202, %203 : vector<16x64xf32>
    %c0_94 = arith.constant 0 : index
    %c0_95 = arith.constant 0 : index
    %205 = vector.load %arg12[%c0_94, %c0_95] : memref<32x64xf32, #tpu.memory_space<vmem>>, vector<32x64xf32>
    %cst_96 = arith.constant dense<0.000000e+00> : vector<16x32xf32>
    %206 = tpu.matmul %204, %205, %cst_96 {dimension_numbers = #tpu.dot_dimension_numbers<[1], [1], [0], [0], [0, 0, 1, 0], [], []>} : vector<16x64xf32>, vector<32x64xf32>, vector<16x32xf32> -> vector<16x32xf32>
    %c0_97 = arith.constant 0 : index
    %c0_98 = arith.constant 0 : index
    %207 = vector.load %arg13[%c0_97, %c0_98] : memref<1x32xf32, #tpu.memory_space<vmem>>, vector<1x32xf32>
    %208 = vector.broadcast %207 : vector<1x32xf32> to vector<16x32xf32>
    %209 = arith.addf %206, %208 : vector<16x32xf32>
    %210 = arith.addf %197, %209 : vector<16x32xf32>
    %c0_99 = arith.constant 0 : index
    %c0_100 = arith.constant 0 : index
    %211 = vector.load %arg14[%c0_99, %c0_100] : memref<1x32xf32, #tpu.memory_space<vmem>>, vector<1x32xf32>
    %c0_101 = arith.constant 0 : index
    %c0_102 = arith.constant 0 : index
    %212 = vector.load %arg15[%c0_101, %c0_102] : memref<1x32xf32, #tpu.memory_space<vmem>>, vector<1x32xf32>
    %cst_103 = arith.constant dense<0.000000e+00> : vector<16xf32>
    %213 = vector.multi_reduction <add>, %210, %cst_103 [1] : vector<16x32xf32> to vector<16xf32>
    %214 = vector.shape_cast %213 : vector<16xf32> to vector<16x1xf32>
    %cst_104 = arith.constant 3.200000e+01 : f32
    %215 = vector.broadcast %cst_104 : f32 to vector<16x1xf32>
    %216 = arith.divf %214, %215 : vector<16x1xf32>
    %217 = vector.broadcast %216 : vector<16x1xf32> to vector<16x32xf32>
    %218 = arith.subf %210, %217 : vector<16x32xf32>
    %219 = arith.mulf %218, %218 : vector<16x32xf32>
    %cst_105 = arith.constant dense<0.000000e+00> : vector<16xf32>
    %220 = vector.multi_reduction <add>, %219, %cst_105 [1] : vector<16x32xf32> to vector<16xf32>
    %221 = vector.shape_cast %220 : vector<16xf32> to vector<16x1xf32>
    %cst_106 = arith.constant 3.200000e+01 : f32
    %222 = vector.broadcast %cst_106 : f32 to vector<16x1xf32>
    %223 = arith.divf %221, %222 : vector<16x1xf32>
    %224 = vector.broadcast %216 : vector<16x1xf32> to vector<16x32xf32>
    %225 = arith.subf %210, %224 : vector<16x32xf32>
    %cst_107 = arith.constant 9.99999974E-6 : f32
    %226 = vector.broadcast %cst_107 : f32 to vector<16x1xf32>
    %227 = arith.addf %223, %226 : vector<16x1xf32>
    %228 = math.rsqrt %227 : vector<16x1xf32>
    %229 = vector.broadcast %228 : vector<16x1xf32> to vector<16x32xf32>
    %230 = arith.mulf %225, %229 : vector<16x32xf32>
    %231 = vector.broadcast %211 : vector<1x32xf32> to vector<16x32xf32>
    %232 = arith.mulf %230, %231 : vector<16x32xf32>
    %233 = vector.broadcast %212 : vector<1x32xf32> to vector<16x32xf32>
    %234 = arith.addf %232, %233 : vector<16x32xf32>
    %c0_108 = arith.constant 0 : index
    %c0_109 = arith.constant 0 : index
    %235 = vector.load %arg16[%c0_108, %c0_109] : memref<16x32xf32, #tpu.memory_space<vmem>>, vector<16x32xf32>
    tpu.vector_store %arg16[%c0_108, %c0_109], %234 {strides = array<i32>} : memref<16x32xf32, #tpu.memory_space<vmem>>, vector<16x32xf32>,
    return
  }
}

</mosaic_0001>

<bundles_post_ra>
// kernel: tpu_custom_call.1
= control target key start
LH: loop header
LB: loop body
LE: loop exit
PB: predicated region body
PF: predicated region fallthrough
CT: control target
= control target key end

     0   :  { %s1821_s0 = inlined_call_operand.vmem [shape: f32[16,32], index: 0, kind: input, shape index: {}]   ;;  %s1822_s1 = inlined_call_operand.vmem [shape: f32[16,32], index: 1, kind: input, shape index: {}]   ;;  %s1823_s2 = inlined_call_operand.vmem [shape: f32[64,32], index: 2, kind: input, shape index: {}]   ;;  %s1824_s3 = inlined_call_operand.vmem [shape: f32[1,64], index: 3, kind: input, shape index: {}]   ;;  %s1825_s4 = inlined_call_operand.vmem [shape: f32[32,32], index: 4, kind: input, shape index: {}]   ;;  %s1826_s5 = inlined_call_operand.vmem [shape: f32[1,32], index: 5, kind: input, shape index: {}]   ;;  %s1827_s6 = inlined_call_operand.vmem [shape: f32[32,32], index: 6, kind: input, shape index: {}]   ;;  %s1828_s7 = inlined_call_operand.vmem [shape: f32[1,32], index: 7, kind: input, shape index: {}]   ;;  %s1829_s8 = inlined_call_operand.vmem [shape: f32[1,32], index: 8, kind: input, shape index: {}]   ;;  %s1830_s9 = inlined_call_operand.vmem [shape: f32[1,32], index: 9, kind: input, shape index: {}]   ;;  %s1831_s10 = inlined_call_operand.vmem [shape: f32[64,32], index: 10, kind: input, shape index: {}]   ;;  %s1832_s11 = inlined_call_operand.vmem [shape: f32[1,64], index: 11, kind: input, shape index: {}]   ;;  %s1833_s12 = inlined_call_operand.vmem [shape: f32[32,64], index: 12, kind: input, shape index: {}]   ;;  %s1834_s13 = inlined_call_operand.vmem [shape: f32[1,32], index: 13, kind: input, shape index: {}]   ;;  %s1835_s14 = inlined_call_operand.vmem [shape: f32[1,32], index: 14, kind: input, shape index: {}]   ;;  %s1836_s15 = inlined_call_operand.vmem [shape: f32[1,32], index: 15, kind: input, shape index: {}]   ;;  %s1837_s16 = inlined_call_operand.hbm [shape: f32[16,32], index: 16, kind: output, shape index: {0}]   ;;  %s1838_s17 = inlined_call_operand.hbm [shape: f32[2,8,8], index: 17, kind: output, shape index: {1}]  }
   0x1   :  { %1841 = sst [smem:[#allocation9_spill]] %s1821_s0 }
   0x2   :  { %1842 = sst [smem:[#allocation10_spill]] %s1822_s1 }
   0x3   :  { %23 = vsyncpa [#allocation4], 0  ;;  %v70_v0 = vld [vmem:[%s1823_s2 + $0x38] sm:$0xff]  ;;  %vm75_vm0 = vcmask 261120   ;;  %v69_v1 = vld [vmem:[%s1823_s2 + $0x30] sm:$0xff] }
   0x4   :  { %1180 = vmatpush.xpose.msk.msra.mxu0 %vm75_vm0, %v70_v0  ;;  %v68_v2 = vld [vmem:[%s1823_s2 + $0x28] sm:$0xff] }
   0x8   :  { %1181 = vmatpush.xpose.msk.msra.mxu0 %vm75_vm0, %v69_v1 }
   0x9   :  { %24 = vsyncpa [#allocation6], 0  ;;  %v67_v3 = vld [vmem:[%s1823_s2 + $0x20] sm:$0xff]  ;;  %v66_v4 = vld [vmem:[%s1823_s2 + $0x18] sm:$0xff]  ;;  %s1843_s25 = sld [smem:[#allocation9_spill]]  ;;  %s1360_s20 = smov 96  }
   0xa   :  { %v65_v5 = vld [vmem:[%s1823_s2 + $0x10] sm:$0xff]  ;;  %v64_v6 = vld [vmem:[%s1823_s2 + $0x8] sm:$0xff]  ;;  %s1844_s28 = sld [smem:[#allocation10_spill]]  ;;  %v63_v9 = vld [vmem:[%s1823_s2] sm:$0xff]  ;;  %s1359_s2 = smov 120   ;;  %vm181_vm1 = vcmask 64512  }
   0xb   :  { %v132_v11 = vld [vmem:[%s1825_s4 + $0x18] sm:$0xff]  ;;  %v1512_v12 = vld [vmem:[%s1824_s3] ss:$0 sm:$0xff]  ;;  %v131_v15 = vld [vmem:[%s1825_s4 + $0x10] sm:$0xff]  ;;  %s1362_s30 = smov 72   ;;  %s1364_s1 = smov 80  }
   0xc   :  { %1182 = vmatpush.xpose.msk.msra.mxu0 %vm75_vm0, %v68_v2  ;;  %1190 = vmatpush.xpose.msk.msra.mxu1 %vm75_vm0, %v132_v11  ;;  %v130_v16 = vld [vmem:[%s1825_s4 + $0x8] sm:$0xff]  ;;  %v129_v17 = vld [vmem:[%s1825_s4] sm:$0xff]  ;;  %s1367_s21 = smov 24   ;;  %s1368_s22 = smov 16  }
   0xd   :  { %v1257_v20 = vld [vmem:[%s1826_s5] ss:$0 sm:$0xff]  ;;  %s1363_s5 = smov 88   ;;  %s1163_s24 = sshll.u32 %s1838_s17, 4  ;;  %s1164_s24 = int_to_ptr.hbm [resolvable:$true] %s1163_s24 }
   0xe   :  { %s1372_s17 = smov [#allocation3]   ;;  %s1150_s4 = sshll.u32 %s1837_s16, 4  ;;  %s1151_s4 = int_to_ptr.hbm [resolvable:$true] %s1150_s4 }
   0xf   :  { %v1494_v7 = vld [vmem:[%s1843_s25] sm:$0xff]  ;;  %v1538_v18 = vld [vmem:[%s1843_s25 + $0x8] sm:$0xff]  ;;  %s1361_s25 = smov 112   ;;  %s1148_s26 = sshll.u32 %s1372_s17, 4  ;;  %s1149_s26 = int_to_ptr.vmem [resolvable:$true] %s1148_s26 }
  0x10   :  { %1183 = vmatpush.xpose.msk.msra.mxu0 %vm75_vm0, %v67_v3  ;;  %v59_v8 = vld [vmem:[%s1844_s28] sm:$0xff]  ;;  %1191 = vmatpush.xpose.msk.msra.mxu1 %vm75_vm0, %v131_v15  ;;  %v60_v47 = vld [vmem:[%s1844_s28 + $0x8] sm:$0xff]  ;;  %s1365_s28 = smov 104  }
  0x11   :  { %v61_v10 = vadd.f32 %v59_v8, %v1494_v7  ;;  %v62_v48 = vadd.f32 %v60_v47, %v1538_v18 }
  0x14   :  { %1184 = vmatpush.xpose.msk.msra.mxu0 %vm75_vm0, %v66_v4  ;;  %1192 = vmatpush.xpose.msk.msra.mxu1 %vm75_vm0, %v130_v16 }
  0x18   :  { %1185 = vmatpush.xpose.msk.msra.mxu0 %vm75_vm0, %v65_v5  ;;  %1193 = vmatpush.xpose.msk.msra.mxu1 %vm75_vm0, %v129_v17 }
  0x1b   :  { %1194 = vmatmul.msk.f32.vlgmr.msra.gmra.mxu1 %vm75_vm0, %v1494_v7 }
  0x1c   :  { %1186 = vmatpush.xpose.msk.msra.mxu0 %vm75_vm0, %v64_v6 }
  0x20   :  { %1187 = vmatpush.xpose.msk.msra.mxu0 %vm75_vm0, %v63_v9 }
  0x23   :  { %1188 = vmatmul.msk.f32.vlgmr.msra.gmra.mxu0 %vm75_vm0, %v61_v10  ;;  %1195 = vmatmul.msk.f32.gmra.mxu1 %vm75_vm0, %v1538_v18 }
  0x2b   :  { %1189 = vmatmul.msk.f32.gmra.mxu0 %vm75_vm0, %v62_v48 }
  0x98   :  { %v172_v21 = vpop.f32.mrf.mxu1 }
  0x99   :  { %v1548_v22 = vadd.f32 %v1257_v20, %v172_v21 }
  0x9b   :  { %248 = vmatpush.msra.mxu3 %v1548_v22 }
  0xa0   :  { %v123_v13 = vpop.f32.mrf.mxu0  ;;  %v175_v23 = vpop.f32.mrf.mxu1 }
  0xa1   :  { %v1515_v14 = vadd.f32 %v1512_v12, %v123_v13  ;;  %v1551_v24 = vadd.f32 %v1257_v20, %v175_v23 }
  0xa3   :  { %256 = vrot.lane.b32.xlu2 %v1515_v14, %s1359_s2  ;;  %179 = vrot.lane.b32.xlu0 %v1515_v14, %s1360_s20 }
  0xa8   :  { %v126_v55 = vpop.f32.mrf.mxu0 }
  0xa9   :  { %v1576_v56 = vadd.f32 %v1512_v12, %v126_v55 }
  0xfd   :  { %v257_v45 = vpop.permute.xlu2 %256 }
 0x115   :  { %v180_v19 = vpop.permute.xlu0 %179 }
 0x116   :  { %1196 = vmatpush.xpose.msk.msrb.mxu1 %vm181_vm1, %v180_v19 }
 0x119   :  { %1197 = vmatmul.msk.f32.vlgmr.msrb.gmra.mxu1 %vm181_vm1, %v1515_v14 }
 0x196   :  { %v203_v25 = vpop.f32.mrf.mxu1 }
 0x197   :  { %v206_v26 = vsel %vm181_vm1, %v203_v25, -inf }
 0x198   :  { %207 = vmax.xlane.f32.xlu0 %v206_v26 }
 0x1ac   :  { %343 = vrot.lane.b32.xlu0 %v1515_v14, %s1361_s25 }
 0x1b4   :  { %431 = vrot.lane.b32.xlu0 %v1515_v14, %s1362_s30 }
 0x1bc   :  { %517 = vrot.lane.b32.xlu0 %v1576_v56, %s1360_s20  ;;  %s1366_s20 = smov 8  }
 0x20b   :  { %v208_v27 = vpop.xlane.xlu0 %207 }
 0x20c   :  { %v209_v28 = vsub.f32 %v203_v25, %v208_v27 }
 0x20e   :  { %v210_v29 = vmul.f32 1.442695, %v209_v28 }
 0x210   :  { %1265 = vpow2.f32 %v210_v29 }
 0x216   :  { %v1266_v30 = vpop.eup %1265 }
 0x217   :  { %v212_v31 = vsel %vm181_vm1, %v1266_v30, 0.0 }
 0x218   :  { %213 = vadd.xlane.f32.xlu1 %v212_v31 }
 0x21e   :  { %v344_v51 = vpop.permute.xlu0 %343 }
 0x226   :  { %v432_v58 = vpop.permute.xlu0 %431 }
 0x22e   :  { %v518_v62 = vpop.permute.xlu0 %517 }
 0x231   :  { %258 = vrot.lane.b32.xlu1 %v1515_v14, %s1363_s5 }
 0x28b   :  { %v214_v32 = vpop.xlane.xlu1 %213 }
 0x28c   :  { %1267 = vrcp.f32 %v214_v32  ;;  %v226_v36 = vand.u32 2147483648, %v214_v32  ;;  %v224_v38 = vand.u32 2147483647, %v214_v32  ;;  %vm220_vm3 = vweird.f32 %v214_v32 }
 0x28e   :  { %v227_v40 = vor.u32 1.1754944e-38, %v226_v36  ;;  %vm225_vm5 = vcmp.eq.f32.partialorder %v224_v38, 8.507059e+37 }
 0x292   :  { %v1268_v33 = vpop.eup %1267 }
 0x293   :  { %v216_v34 = vmul.f32 %v1268_v33, %v214_v32  ;;  %vm221_vm2 = vweird.f32 %v1268_v33 }
 0x294   :  { %vm222_vm4 = vmor %vm220_vm3, %vm221_vm2 }
 0x295   :  { %v217_v35 = vsub.f32 1.0, %v216_v34 }
 0x297   :  { %v218_v37 = vmul.f32 %v1268_v33, %v217_v35 }
 0x299   :  { %v219_v39 = vadd.f32 %v1268_v33, %v218_v37 }
 0x29b   :  { %v223_v41 = vsel %vm222_vm4, %v1268_v33, %v219_v39 }
 0x29c   :  { %v228_v42 = vsel %vm225_vm5, %v227_v40, %v223_v41 }
 0x29d   :  { %v229_v43 = vmul.f32 %v1266_v30, %v228_v42 }
 0x29f   :  { %1198 = vmatmul.msk.f32.vlgmr.msra.gmra.mxu3 %vm181_vm1, %v229_v43 }
 0x2a3   :  { %v259_v44 = vpop.permute.xlu1 %258 }
 0x2a4   :  { %1199 = vmatpush.xpose.msk.msrb.mxu3 %vm181_vm1, %v259_v44 }
 0x2a7   :  { %1200 = vmatmul.msk.f32.vlgmr.msrb.gmra.mxu3 %vm181_vm1, %v257_v45 }
 0x322   :  { %v250_v46 = vpop.f32.mrf.mxu3 }
 0x323   :  { %253 = vst.msk [vmem:[#allocation2] sm:$0xff] %vm181_vm1, %v250_v46 }
 0x32a   :  { %v281_v49 = vpop.f32.mrf.mxu3 }
 0x32b   :  { %v284_v50 = vsel %vm181_vm1, %v281_v49, -inf }
 0x32c   :  { %285 = vmax.xlane.f32.xlu2 %v284_v50 }
 0x344   :  { %345 = vrot.lane.b32.xlu2 %v1515_v14, %s1364_s1 }
 0x34c   :  { %309 = vrot.lane.b32.xlu2 %v1548_v22, %s1359_s2 }
 0x39f   :  { %v286_v52 = vpop.xlane.xlu2 %285 }
 0x3a0   :  { %v287_v53 = vsub.f32 %v281_v49, %v286_v52 }
 0x3a2   :  { %v288_v54 = vmul.f32 1.442695, %v287_v53 }
 0x3a4   :  { %1269 = vpow2.f32 %v288_v54 }
 0x3a7   :  { %v346_v57 = vpop.permute.xlu2 %345 }
 0x3a8   :  { %1202 = vmatpush.xpose.msk.msra.mxu3 %vm181_vm1, %v346_v57 }
 0x3aa   :  { %v1270_v59 = vpop.eup %1269 }
 0x3ab   :  { %1203 = vmatmul.msk.f32.vlgmr.msra.gmra.mxu3 %vm181_vm1, %v344_v51  ;;  %v290_v60 = vsel %vm181_vm1, %v1270_v59, 0.0 }
 0x3ac   :  { %1205 = vmatpush.xpose.msk.msrb.mxu3 %vm181_vm1, %v432_v58  ;;  %291 = vadd.xlane.f32.xlu1 %v290_v60 }
 0x3af   :  { %v310_v61 = vpop.permute.xlu2 %309 }
 0x3b0   :  { %585 = vmatpush.msra.mxu3 %v1551_v24  ;;  %330 = vmatpush.msra.mxu1 %v310_v61 }
 0x3b2   :  { %1208 = vmatpush.xpose.msk.msrb.mxu1 %vm181_vm1, %v518_v62 }
 0x3c5   :  { %429 = vrot.lane.b32.xlu1 %v1515_v14, %s1365_s28  ;;  %v254_v14 = vmul.f32 0.25, %v229_v43 }
 0x41f   :  { %v292_v63 = vpop.xlane.xlu1 %291 }
 0x420   :  { %1271 = vrcp.f32 %v292_v63  ;;  %v304_v3 = vand.u32 2147483648, %v292_v63  ;;  %v302_v5 = vand.u32 2147483647, %v292_v63  ;;  %vm298_vm7 = vweird.f32 %v292_v63 }
 0x422   :  { %v305_v8 = vor.u32 1.1754944e-38, %v304_v3  ;;  %vm303_vm9 = vcmp.eq.f32.partialorder %v302_v5, 8.507059e+37 }
 0x426   :  { %v1272_v0 = vpop.eup %1271 }
 0x427   :  { %v294_v1 = vmul.f32 %v1272_v0, %v292_v63  ;;  %vm299_vm6 = vweird.f32 %v1272_v0 }
 0x428   :  { %vm300_vm8 = vmor %vm298_vm7, %vm299_vm6 }
 0x429   :  { %v295_v2 = vsub.f32 1.0, %v294_v1 }
 0x42b   :  { %v296_v4 = vmul.f32 %v1272_v0, %v295_v2 }
 0x42d   :  { %v297_v6 = vadd.f32 %v1272_v0, %v296_v4 }
 0x42e   :  { %v368_v9 = vpop.f32.mrf.mxu3 }
 0x42f   :  { %v301_v10 = vsel %vm300_vm8, %v1272_v0, %v297_v6  ;;  %v371_v11 = vsel %vm181_vm1, %v368_v9, -inf }
 0x430   :  { %v306_v12 = vsel %vm303_vm9, %v305_v8, %v301_v10  ;;  %372 = vmax.xlane.f32.xlu2 %v371_v11 }
 0x431   :  { %v307_v13 = vmul.f32 %v1270_v59, %v306_v12 }
 0x433   :  { %1201 = vmatmul.msk.f32.vlgmr.msra.gmra.mxu1 %vm181_vm1, %v307_v13  ;;  %v341_v15 = vmul.f32 0.25, %v307_v13 }
 0x435   :  { %v1590_v16 = vadd.f32 %v341_v15, %v254_v14 }
 0x437   :  { %v430_v17 = vpop.permute.xlu1 %429 }
 0x438   :  { %1206 = vmatmul.msk.f32.vlgmr.msrb.gmra.mxu3 %vm181_vm1, %v430_v17 }
 0x43b   :  { %1209 = vmatmul.msk.f32.vlgmr.msrb.gmra.mxu1 %vm181_vm1, %v1576_v56 }
 0x4a3   :  { %v373_v19 = vpop.xlane.xlu2 %372 }
 0x4a4   :  { %v374_v20 = vsub.f32 %v368_v9, %v373_v19 }
 0x4a6   :  { %v375_v21 = vmul.f32 1.442695, %v374_v20 }
 0x4a8   :  { %1273 = vpow2.f32 %v375_v21 }
 0x4ae   :  { %v1595_v23 = vpop.eup %1273 }
 0x4af   :  { %v377_v25 = vsel %vm181_vm1, %v1595_v23, 0.0 }
 0x4b0   :  { %v1599_v26 = vpop.f32.mrf.mxu1  ;;  %378 = vadd.xlane.f32.xlu2 %v377_v25 }
 0x4b8   :  { %v540_v27 = vpop.f32.mrf.mxu1 }
 0x4b9   :  { %v543_v28 = vsel %vm181_vm1, %v540_v27, -inf }
 0x4ba   :  { %544 = vmax.xlane.f32.xlu1 %v543_v28 }
 0x4bb   :  { %v454_v29 = vpop.f32.mrf.mxu3 }
 0x4bc   :  { %v457_v30 = vsel %vm181_vm1, %v454_v29, -inf }
 0x4bd   :  { %458 = vmax.xlane.f32.xlu0 %v457_v30 }
 0x4c8   :  { %481 = vrot.lane.b32.xlu2 %v1548_v22, %s1365_s28 }
 0x4d0   :  { %593 = vrot.lane.b32.xlu2 %v1576_v56, %s1359_s2 }
 0x4d3   :  { %595 = vrot.lane.b32.xlu1 %v1576_v56, %s1363_s5 }
 0x4db   :  { %766 = vrot.lane.b32.xlu1 %v1576_v56, %s1362_s30 }
 0x523   :  { %v379_v43 = vpop.xlane.xlu2 %378 }
 0x524   :  { %v391_v52 = vand.u32 2147483648, %v379_v43  ;;  %vm385_vm11 = vweird.f32 %v379_v43  ;;  %v389_v53 = vand.u32 2147483647, %v379_v43 }
 0x526   :  { %v392_v58 = vor.u32 1.1754944e-38, %v391_v52  ;;  %vm390_vm13 = vcmp.eq.f32.partialorder %v389_v53, 8.507059e+37 }
 0x52b   :  { %v482_v44 = vpop.permute.xlu2 %481 }
 0x52d   :  { %v545_v31 = vpop.xlane.xlu1 %544 }
 0x52e   :  { %v546_v32 = vsub.f32 %v540_v27, %v545_v31 }
 0x530   :  { %v547_v33 = vmul.f32 1.442695, %v546_v32  ;;  %v459_v34 = vpop.xlane.xlu0 %458 }
 0x531   :  { %v460_v35 = vsub.f32 %v454_v29, %v459_v34 }
 0x532   :  { %1275 = vpow2.f32 %v547_v33 }
 0x533   :  { %v461_v36 = vmul.f32 1.442695, %v460_v35  ;;  %v1630_v47 = vpop.permute.xlu2 %593 }
 0x535   :  { %1277 = vpow2.f32 %v461_v36 }
 0x536   :  { %1279 = vrcp.f32 %v379_v43 }
 0x538   :  { %v1611_v37 = vpop.eup %1275 }
 0x539   :  { %v549_v38 = vsel %vm181_vm1, %v1611_v37, 0.0 }
 0x53a   :  { %550 = vadd.xlane.f32.xlu2 %v549_v38 }
 0x53b   :  { %v1615_v39 = vpop.eup %1277 }
 0x53c   :  { %v463_v40 = vsel %vm181_vm1, %v1615_v39, 0.0  ;;  %v1280_v45 = vpop.eup %1279 }
 0x53d   :  { %464 = vadd.xlane.f32.xlu0 %v463_v40  ;;  %v381_v46 = vmul.f32 %v1280_v45, %v379_v43  ;;  %vm386_vm10 = vweird.f32 %v1280_v45 }
 0x53e   :  { %vm387_vm12 = vmor %vm385_vm11, %vm386_vm10 }
 0x53f   :  { %v382_v48 = vsub.f32 1.0, %v381_v46 }
 0x541   :  { %v383_v49 = vmul.f32 %v1280_v45, %v382_v48 }
 0x543   :  { %v384_v51 = vadd.f32 %v1280_v45, %v383_v49 }
 0x545   :  { %v1619_v41 = vpop.permute.xlu1 %595  ;;  %v388_v57 = vsel %vm387_vm12, %v1280_v45, %v384_v51 }
 0x546   :  { %v393_v63 = vsel %vm390_vm13, %v392_v58, %v388_v57  ;;  %v854_v58 = vld [vmem:[%s1827_s6 + $0x8] sm:$0xff] }
 0x547   :  { %v394_v5 = vmul.f32 %v1595_v23, %v393_v63  ;;  %v853_v63 = vld [vmem:[%s1827_s6] sm:$0xff] }
 0x549   :  { %v427_v15 = vmul.f32 0.25, %v394_v5 }
 0x54b   :  { %v428_v23 = vadd.f32 %v427_v15, %v1590_v16 }
 0x54d   :  { %v767_v42 = vpop.permute.xlu1 %766 }
 0x54e   :  { %1217 = vmatpush.xpose.msk.msrb.mxu0 %vm181_vm1, %v767_v42 }
 0x551   :  { %395 = vrot.lane.b32.xlu0 %v1548_v22, %s1361_s25 }
 0x552   :  { %764 = vrot.lane.b32.xlu2 %v1576_v56, %s1365_s28 }
 0x559   :  { %681 = vrot.lane.b32.xlu0 %v1576_v56, %s1364_s1 }
 0x561   :  { %679 = vrot.lane.b32.xlu0 %v1576_v56, %s1361_s25 }
 0x5ad   :  { %v551_v50 = vpop.xlane.xlu2 %550 }
 0x5ae   :  { %1281 = vrcp.f32 %v551_v50  ;;  %v563_v61 = vand.u32 2147483648, %v551_v50  ;;  %v561_v1 = vand.u32 2147483647, %v551_v50  ;;  %vm557_vm15 = vweird.f32 %v551_v50 }
 0x5b0   :  { %v465_v22 = vpop.xlane.xlu0 %464  ;;  %v564_v6 = vor.u32 1.1754944e-38, %v563_v61  ;;  %vm562_vm4 = vcmp.eq.f32.partialorder %v561_v1, 8.507059e+37 }
 0x5b1   :  { %1283 = vrcp.f32 %v465_v22  ;;  %v477_v4 = vand.u32 2147483648, %v465_v22  ;;  %v475_v9 = vand.u32 2147483647, %v465_v22  ;;  %vm471_vm5 = vweird.f32 %v465_v22 }
 0x5b3   :  { %v478_v13 = vor.u32 1.1754944e-38, %v477_v4  ;;  %vm476_vm7 = vcmp.eq.f32.partialorder %v475_v9, 8.507059e+37 }
 0x5b4   :  { %v1282_v54 = vpop.eup %1281 }
 0x5b5   :  { %v553_v55 = vmul.f32 %v1282_v54, %v551_v50  ;;  %v765_v56 = vpop.permute.xlu2 %764  ;;  %vm558_vm14 = vweird.f32 %v1282_v54 }
 0x5b6   :  { %1218 = vmatmul.msk.f32.vlgmr.msrb.gmra.mxu0 %vm181_vm1, %v765_v56  ;;  %vm559_vm2 = vmor %vm557_vm15, %vm558_vm14 }
 0x5b7   :  { %v1284_v59 = vpop.eup %1283  ;;  %v554_v60 = vsub.f32 1.0, %v553_v55 }
 0x5b8   :  { %v467_v62 = vmul.f32 %v1284_v59, %v465_v22  ;;  %vm472_vm3 = vweird.f32 %v1284_v59 }
 0x5b9   :  { %v555_v0 = vmul.f32 %v1282_v54, %v554_v60  ;;  %vm473_vm6 = vmor %vm471_vm5, %vm472_vm3 }
 0x5ba   :  { %v468_v2 = vsub.f32 1.0, %v467_v62 }
 0x5bb   :  { %v556_v3 = vadd.f32 %v1282_v54, %v555_v0 }
 0x5bc   :  { %v469_v8 = vmul.f32 %v1284_v59, %v468_v2 }
 0x5bd   :  { %v560_v10 = vsel %vm559_vm2, %v1282_v54, %v556_v3  ;;  %v856_v54 = vld [vmem:[%s1827_s6 + $0x18] sm:$0xff] }
 0x5be   :  { %v565_v11 = vsel %vm562_vm4, %v564_v6, %v560_v10  ;;  %v470_v12 = vadd.f32 %v1284_v59, %v469_v8 }
 0x5bf   :  { %v1635_v14 = vmul.f32 %v1611_v37, %v565_v11 }
 0x5c0   :  { %v474_v17 = vsel %vm473_vm6, %v1284_v59, %v470_v12  ;;  %vm339_vm6 = vcmask 130112  }
 0x5c1   :  { %1210 = vmatmul.msk.f32.vlgmr.msra.gmra.mxu3 %vm181_vm1, %v1635_v14  ;;  %v479_v19 = vsel %vm476_vm7, %v478_v13, %v474_v17  ;;  %vm425_vm7 = vcmask 195712  }
 0x5c2   :  { %v480_v20 = vmul.f32 %v1615_v39, %v479_v19 }
 0x5c3   :  { %v396_v21 = vpop.permute.xlu0 %395 }
 0x5c4   :  { %416 = vmatpush.msra.mxu2 %v396_v21  ;;  %v513_v25 = vmul.f32 0.25, %v480_v20 }
 0x5c5   :  { %1204 = vmatmul.msk.f32.vlgmr.msra.gmra.mxu2 %vm181_vm1, %v394_v5 }
 0x5c6   :  { %502 = vmatpush.msrb.mxu2 %v482_v44  ;;  %v514_v27 = vadd.f32 %v513_v25, %v428_v23 }
 0x5c8   :  { %1211 = vmatpush.xpose.msk.msra.mxu2 %vm181_vm1, %v1619_v41  ;;  %515 = vst.msk [vmem:[#allocation5] sm:$0xff] %vm181_vm1, %v514_v27 }
 0x5cb   :  { %v682_v28 = vpop.permute.xlu0 %681 }
 0x5cc   :  { %1214 = vmatpush.xpose.msk.msrb.mxu3 %vm181_vm1, %v682_v28 }
 0x5cd   :  { %1207 = vmatmul.msk.f32.vlgmr.msrb.gmra.mxu2 %vm181_vm1, %v480_v20 }
 0x5d0   :  { %1220 = vmatpush.xpose.msk.msra.mxu3 %vm75_vm0, %v856_v54 }
 0x5d3   :  { %v680_v29 = vpop.permute.xlu0 %679 }
 0x5d4   :  { %1215 = vmatmul.msk.f32.vlgmr.msrb.gmra.mxu3 %vm181_vm1, %v680_v29 }
 0x5d5   :  { %1212 = vmatmul.msk.f32.vlgmr.msra.gmra.mxu2 %vm181_vm1, %v1630_v47 }
 0x633   :  { %v789_v16 = vpop.f32.mrf.mxu0 }
 0x634   :  { %v792_v30 = vsel %vm181_vm1, %v789_v16, -inf }
 0x635   :  { %793 = vmax.xlane.f32.xlu2 %v792_v30 }
 0x644   :  { %v587_v31 = vpop.f32.mrf.mxu3 }
 0x645   :  { %590 = vst.msk [vmem:[#allocation2 + $0x8] sm:$0xff] %vm181_vm1, %v587_v31 }
 0x648   :  { %v418_v32 = vpop.f32.mrf.mxu2 }
 0x650   :  { %v504_v33 = vpop.f32.mrf.mxu2 }
 0x657   :  { %v704_v34 = vpop.f32.mrf.mxu3 }
 0x658   :  { %v618_v35 = vpop.f32.mrf.mxu2  ;;  %v707_v36 = vsel %vm181_vm1, %v704_v34, -inf }
 0x659   :  { %708 = vmax.xlane.f32.xlu1 %v707_v36  ;;  %v621_v37 = vsel %vm181_vm1, %v618_v35, -inf }
 0x65a   :  { %622 = vmax.xlane.f32.xlu0 %v621_v37 }
 0x6a8   :  { %v794_v38 = vpop.xlane.xlu2 %793 }
 0x6a9   :  { %v795_v39 = vsub.f32 %v789_v16, %v794_v38 }
 0x6ab   :  { %v796_v40 = vmul.f32 1.442695, %v795_v39 }
 0x6ad   :  { %1285 = vpow2.f32 %v796_v40 }
 0x6b3   :  { %v1654_v41 = vpop.eup %1285 }
 0x6b4   :  { %v798_v42 = vsel %vm181_vm1, %v1654_v41, 0.0 }
 0x6b5   :  { %799 = vadd.xlane.f32.xlu2 %v798_v42 }
 0x6cc   :  { %v709_v43 = vpop.xlane.xlu1 %708 }
 0x6cd   :  { %v710_v44 = vsub.f32 %v704_v34, %v709_v43  ;;  %816 = vrot.lane.b32.xlu2 %v1551_v24, %s1365_s28  ;;  %v623_v45 = vpop.xlane.xlu0 %622 }
 0x6ce   :  { %v624_v46 = vsub.f32 %v618_v35, %v623_v45 }
 0x6cf   :  { %v711_v47 = vmul.f32 1.442695, %v710_v44 }
 0x6d0   :  { %v625_v48 = vmul.f32 1.442695, %v624_v46 }
 0x6d1   :  { %1287 = vpow2.f32 %v711_v47 }
 0x6d2   :  { %1289 = vpow2.f32 %v625_v48 }
 0x6d7   :  { %v1660_v49 = vpop.eup %1287 }
 0x6d8   :  { %v1662_v50 = vpop.eup %1289  ;;  %v713_v22 = vsel %vm181_vm1, %v1660_v49, 0.0 }
 0x6d9   :  { %714 = vadd.xlane.f32.xlu1 %v713_v22  ;;  %v627_v51 = vsel %vm181_vm1, %v1662_v50, 0.0 }
 0x6da   :  { %628 = vadd.xlane.f32.xlu0 %v627_v51 }
 0x6ee   :  { %646 = vrot.lane.b32.xlu0 %v1551_v24, %s1359_s2 }
 0x6f2   :  { %731 = vrot.lane.b32.xlu1 %v1551_v24, %s1361_s25 }
 0x6f6   :  { %336 = vrot.lane.b32.xlu0 %v1599_v26, %s1366_s20  ;;  %v855_v26 = vld [vmem:[%s1827_s6 + $0x10] sm:$0xff] }
 0x6f7   :  { %1221 = vmatpush.xpose.msk.msra.mxu3 %vm75_vm0, %v855_v26 }
 0x6fa   :  { %508 = vrot.lane.b32.xlu1 %v504_v33, %s1367_s21  ;;  %v591_v33 = vmul.f32 0.25, %v1635_v14 }
 0x6fb   :  { %1222 = vmatpush.xpose.msk.msra.mxu3 %vm75_vm0, %v854_v58 }
 0x6fe   :  { %422 = vrot.lane.b32.xlu0 %v418_v32, %s1368_s22 }
 0x6ff   :  { %1223 = vmatpush.xpose.msk.msra.mxu3 %vm75_vm0, %v853_v63 }
 0x728   :  { %v800_v52 = vpop.xlane.xlu2 %799 }
 0x729   :  { %1291 = vrcp.f32 %v800_v52  ;;  %vm806_vm8 = vweird.f32 %v800_v52  ;;  %v812_v1 = vand.u32 2147483648, %v800_v52  ;;  %v810_v10 = vand.u32 2147483647, %v800_v52 }
 0x72b   :  { %v813_v21 = vor.u32 1.1754944e-38, %v812_v1  ;;  %vm811_vm4 = vcmp.eq.f32.partialorder %v810_v10, 8.507059e+37 }
 0x72f   :  { %v1292_v53 = vpop.eup %1291 }
 0x730   :  { %v802_v55 = vmul.f32 %v1292_v53, %v800_v52  ;;  %vm807_vm9 = vweird.f32 %v1292_v53  ;;  %v817_v36 = vpop.permute.xlu2 %816 }
 0x731   :  { %vm1693_vm12 = vmor %vm806_vm8, %vm807_vm9  ;;  %vm511_vm8 = vcmask 261312  }
 0x732   :  { %v803_v57 = vsub.f32 1.0, %v802_v55 }
 0x734   :  { %v804_v60 = vmul.f32 %v1292_v53, %v803_v57 }
 0x736   :  { %v805_v3 = vadd.f32 %v1292_v53, %v804_v60 }
 0x738   :  { %v809_v17 = vsel %vm1693_vm12, %v1292_v53, %v805_v3  ;;  %v973_v3 = vld [vmem:[%s1831_s10 + $0x30] sm:$0xff]  ;;  %vm1042_vm12 = vcmask 523264  }
 0x739   :  { %v814_v29 = vsel %vm811_vm4, %v813_v21, %v809_v17 }
 0x73a   :  { %v815_v35 = vmul.f32 %v1654_v41, %v814_v29  ;;  %v1259_v29 = vld [vmem:[%s1829_s8] ss:$0 sm:$0xff] }
 0x73c   :  { %v847_v40 = vmul.f32 0.25, %v815_v35 }
 0x74c   :  { %v715_v24 = vpop.xlane.xlu1 %714 }
 0x74d   :  { %1293 = vrcp.f32 %v715_v24  ;;  %v629_v56 = vpop.xlane.xlu0 %628  ;;  %v727_v4 = vand.u32 2147483648, %v715_v24  ;;  %v725_v8 = vand.u32 2147483647, %v715_v24  ;;  %vm721_vm13 = vweird.f32 %v715_v24 }
 0x74e   :  { %1295 = vrcp.f32 %v629_v56  ;;  %v641_v9 = vand.u32 2147483648, %v629_v56  ;;  %v639_v12 = vand.u32 2147483647, %v629_v56  ;;  %vm635_vm15 = vweird.f32 %v629_v56 }
 0x74f   :  { %v728_v19 = vor.u32 1.1754944e-38, %v727_v4  ;;  %vm726_vm2 = vcmp.eq.f32.partialorder %v725_v8, 8.507059e+37  ;;  %v972_v4 = vld [vmem:[%s1831_s10 + $0x28] sm:$0xff] }
 0x750   :  { %v642_v25 = vor.u32 1.1754944e-38, %v641_v9  ;;  %vm640_vm5 = vcmp.eq.f32.partialorder %v639_v12, 8.507059e+37  ;;  %v969_v9 = vld [vmem:[%s1831_s10 + $0x10] sm:$0xff]  ;;  %v968_v12 = vld [vmem:[%s1831_s10 + $0x8] sm:$0xff] }
 0x753   :  { %v1294_v59 = vpop.eup %1293 }
 0x754   :  { %v1296_v61 = vpop.eup %1295  ;;  %v717_v62 = vmul.f32 %v1294_v59, %v715_v24  ;;  %vm722_vm10 = vweird.f32 %v1294_v59  ;;  %v1369_v24 = vmov 32.0  }
 0x755   :  { %v631_v0 = vmul.f32 %v1296_v61, %v629_v56  ;;  %vm636_vm11 = vweird.f32 %v1296_v61  ;;  %vm723_vm14 = vmor %vm721_vm13, %vm722_vm10  ;;  %1297 = vrcp.f32 %v1369_v24 }
 0x756   :  { %v718_v2 = vsub.f32 1.0, %v717_v62  ;;  %vm637_vm3 = vmor %vm635_vm15, %vm636_vm11 }
 0x757   :  { %v632_v5 = vsub.f32 1.0, %v631_v0 }
 0x758   :  { %v719_v6 = vmul.f32 %v1294_v59, %v718_v2  ;;  %v974_v2 = vld [vmem:[%s1831_s10 + $0x38] sm:$0xff] }
 0x759   :  { %v633_v11 = vmul.f32 %v1296_v61, %v632_v5  ;;  %v971_v5 = vld [vmem:[%s1831_s10 + $0x20] sm:$0xff] }
 0x75a   :  { %v720_v15 = vadd.f32 %v1294_v59, %v719_v6  ;;  %v970_v6 = vld [vmem:[%s1831_s10 + $0x18] sm:$0xff] }
 0x75b   :  { %v634_v20 = vadd.f32 %v1296_v61, %v633_v11  ;;  %v1298_v56 = vpop.eup %1297 }
 0x75c   :  { %v724_v23 = vsel %vm723_vm14, %v1294_v59, %v720_v15  ;;  %v913_v57 = vmul.f32 32.0, %v1298_v56  ;;  %v967_v15 = vld [vmem:[%s1831_s10] sm:$0xff] }
 0x75d   :  { %v729_v27 = vsel %vm726_vm2, %v728_v19, %v724_v23  ;;  %v638_v28 = vsel %vm637_vm3, %v1296_v61, %v634_v20 }
 0x75e   :  { %v643_v16 = vsel %vm640_vm5, %v642_v25, %v638_v28  ;;  %v730_v31 = vmul.f32 %v1660_v49, %v729_v27  ;;  %v1258_v49 = vld [vmem:[%s1828_s7] ss:$0 sm:$0xff] }
 0x75f   :  { %v644_v30 = vmul.f32 %v1662_v50, %v643_v16 }
 0x760   :  { %v647_v32 = vpop.permute.xlu0 %646  ;;  %v762_v38 = vmul.f32 0.25, %v730_v31 }
 0x761   :  { %667 = vmatpush.msra.mxu1 %v647_v32  ;;  %v677_v34 = vmul.f32 0.25, %v644_v30 }
 0x762   :  { %1213 = vmatmul.msk.f32.vlgmr.msra.gmra.mxu1 %vm181_vm1, %v644_v30 }
 0x763   :  { %v678_v37 = vadd.f32 %v677_v34, %v591_v33  ;;  %837 = vmatpush.msrb.mxu1 %v817_v36  ;;  %v1037_v34 = vld [vmem:[%s1833_s12 + $0x18] sm:$0xff]  ;;  %v1035_v36 = vld [vmem:[%s1833_s12 + $0x8] sm:$0xff] }
 0x764   :  { %v732_v39 = vpop.permute.xlu1 %731  ;;  %1236 = vmatpush.xpose.msk.msra.mxu0 %vm1042_vm12, %v1037_v34 }
 0x765   :  { %752 = vmatpush.msrb.mxu2 %v732_v39  ;;  %v763_v42 = vadd.f32 %v762_v38, %v678_v37 }
 0x766   :  { %1216 = vmatmul.msk.f32.vlgmr.msrb.gmra.mxu2 %vm181_vm1, %v730_v31  ;;  %v1260_v31 = vld [vmem:[%s1830_s9] ss:$0 sm:$0xff] }
 0x767   :  { %v848_v43 = vadd.f32 %v847_v40, %v763_v42  ;;  %1226 = vmatpush.xpose.msk.msra.mxu2 %vm75_vm0, %v974_v2 }
 0x768   :  { %v337_v44 = vpop.permute.xlu0 %336 }
 0x769   :  { %340 = vst.msk [vmem:[#allocation2] sm:$0xff] %vm339_vm6, %v337_v44  ;;  %v1261_v44 = vld [vmem:[%s1832_s11] ss:$0 sm:$0xff] }
 0x76a   :  { %1219 = vmatmul.msk.f32.vlgmr.msrb.gmra.mxu1 %vm181_vm1, %v815_v35  ;;  %850 = vst.msk [vmem:[#allocation5 + $0x8] sm:$0xff] %vm181_vm1, %v848_v43  ;;  %vm917_vm1 = vweird.f32 %v1298_v56  ;;  %v1036_v35 = vld [vmem:[%s1833_s12 + $0x10] sm:$0xff]  ;;  %v1034_v43 = vld [vmem:[%s1833_s12] sm:$0xff] }
 0x76b   :  { %1227 = vmatpush.xpose.msk.msra.mxu2 %vm75_vm0, %v973_v3  ;;  %1237 = vmatpush.xpose.msk.msra.mxu0 %vm1042_vm12, %v1036_v35 }
 0x76c   :  { %v509_v41 = vpop.permute.xlu1 %508 }
 0x76f   :  { %1228 = vmatpush.xpose.msk.msra.mxu2 %vm75_vm0, %v972_v4  ;;  %1238 = vmatpush.xpose.msk.msra.mxu0 %vm1042_vm12, %v1035_v36 }
 0x770   :  { %v423_v14 = vpop.permute.xlu0 %422 }
 0x771   :  { %426 = vst.msk [vmem:[#allocation2] sm:$0xff] %vm425_vm7, %v423_v14 }
 0x772   :  { %512 = vst.msk [vmem:[#allocation2] sm:$0xff] %vm511_vm8, %v509_v41 }
 0x773   :  { %1229 = vmatpush.xpose.msk.msra.mxu2 %vm75_vm0, %v971_v5  ;;  %1239 = vmatpush.xpose.msk.msra.mxu0 %vm1042_vm12, %v1034_v43 }
 0x777   :  { %1230 = vmatpush.xpose.msk.msra.mxu2 %vm75_vm0, %v970_v6 }
 0x779   :  { %v851_v45 = vld [vmem:[#allocation2] sm:$0xff] }
 0x77a   :  { %1224 = vmatmul.msk.f32.vlgmr.msra.gmra.mxu3 %vm75_vm0, %v851_v45 }
 0x77b   :  { %1231 = vmatpush.xpose.msk.msra.mxu2 %vm75_vm0, %v969_v9 }
 0x77f   :  { %1232 = vmatpush.xpose.msk.msra.mxu2 %vm75_vm0, %v968_v12 }
 0x783   :  { %1233 = vmatpush.xpose.msk.msra.mxu2 %vm75_vm0, %v967_v15 }
 0x7df   :  { %v669_v46 = vpop.f32.mrf.mxu1 }
 0x7e0   :  { %673 = vrot.lane.b32.xlu2 %v669_v46, %s1366_s20 }
 0x7e7   :  { %v839_v47 = vpop.f32.mrf.mxu1 }
 0x7e8   :  { %843 = vrot.lane.b32.xlu1 %v839_v47, %s1367_s21 }
 0x7e9   :  { %v754_v48 = vpop.f32.mrf.mxu2 }
 0x7ea   :  { %758 = vrot.lane.b32.xlu0 %v754_v48, %s1368_s22 }
 0x7fd   :  { %v896_v50 = vpop.f32.mrf.mxu3 }
 0x7fe   :  { %v897_v22 = vadd.f32 %v1258_v49, %v896_v50 }
 0x800   :  { %v902_v51 = vadd.f32 %v897_v22, %v1494_v7  ;;  %v914_v7 = vsub.f32 1.0, %v913_v57 }
 0x802   :  { %v906_v52 = vsel %vm75_vm0, %v902_v51, 0.0  ;;  %v915_v58 = vmul.f32 %v1298_v56, %v914_v7 }
 0x804   :  { %v916_v59 = vadd.f32 %v1298_v56, %v915_v58 }
 0x806   :  { %v1723_v60 = vsel %vm917_vm1, %v1298_v56, %v916_v59  ;;  %v1262_v56 = vld [vmem:[%s1834_s13] ss:$0 sm:$0xff] }
 0x809   :  { %907 = vadd.xlane.f32.xlu2 %v906_v52 }
 0x83a   :  { %v674_v53 = vpop.permute.xlu2 %673 }
 0x83b   :  { %676 = vst.msk [vmem:[#allocation2 + $0x8] sm:$0xff] %vm339_vm6, %v674_v53 }
 0x85a   :  { %v844_v55 = vpop.permute.xlu1 %843 }
 0x85c   :  { %v759_v54 = vpop.permute.xlu0 %758 }
 0x85d   :  { %761 = vst.msk [vmem:[#allocation2 + $0x8] sm:$0xff] %vm425_vm7, %v759_v54 }
 0x85e   :  { %846 = vst.msk [vmem:[#allocation2 + $0x8] sm:$0xff] %vm511_vm8, %v844_v55 }
 0x865   :  { %v852_v26 = vld [vmem:[#allocation2 + $0x8] sm:$0xff] }
 0x866   :  { %1225 = vmatmul.msk.f32.gmra.mxu3 %vm75_vm0, %v852_v26 }
 0x87c   :  { %v908_v61 = vpop.xlane.xlu2 %907 }
 0x87d   :  { %v919_v62 = vmul.f32 %v1723_v60, %v908_v61 }
 0x87f   :  { %v921_v63 = vsub.f32 %v902_v51, %v919_v62 }
 0x881   :  { %v923_v0 = vmul.f32 %v921_v63, %v921_v63 }
 0x883   :  { %v925_v1 = vsel %vm75_vm0, %v923_v0, 0.0 }
 0x884   :  { %926 = vadd.xlane.f32.xlu1 %v925_v1 }
 0x8e9   :  { %v899_v8 = vpop.f32.mrf.mxu3 }
 0x8ea   :  { %v900_v10 = vadd.f32 %v1258_v49, %v899_v8 }
 0x8ec   :  { %v903_v11 = vadd.f32 %v900_v10, %v1538_v18 }
 0x8ee   :  { %v909_v13 = vsel %vm75_vm0, %v903_v11, 0.0 }
 0x8ef   :  { %910 = vadd.xlane.f32.xlu0 %v909_v13 }
 0x8f7   :  { %v927_v17 = vpop.xlane.xlu1 %926 }
 0x8f8   :  { %v931_v19 = vmul.f32 %v927_v17, %v1723_v60 }
 0x8fa   :  { %v933_v20 = vadd.f32 1e-05, %v931_v19 }
 0x8fc   :  { %1299 = vrsqrt.f32 %v933_v20  ;;  %vm941_vm10 = vweird.f32 %v933_v20 }
 0x902   :  { %v1300_v18 = vpop.eup %1299 }
 0x903   :  { %v936_v21 = vmul.f32 %v1300_v18, %v933_v20  ;;  %vm942_vm9 = vweird.f32 %v1300_v18 }
 0x904   :  { %vm943_vm11 = vmor %vm941_vm10, %vm942_vm9 }
 0x905   :  { %v937_v23 = vmul.f32 %v1300_v18, %v936_v21  ;;  %v1263_v21 = vld [vmem:[%s1835_s14] ss:$0 sm:$0xff]  ;;  %s1370_s14 = smov [#allocation5]  }
 0x906   :  { %s1161_s3 = sshll.u32 %s1370_s14, 4  ;;  %s1162_s3 = int_to_ptr.vmem [resolvable:$true] %s1161_s3 }
 0x907   :  { %v938_v25 = vmul.f32 0.5, %v937_v23 }
 0x909   :  { %v939_v27 = vsub.f32 1.5, %v938_v25 }
 0x90b   :  { %v940_v28 = vmul.f32 %v1300_v18, %v939_v27  ;;  %v1264_v27 = vld [vmem:[%s1836_s15] ss:$0 sm:$0xff]  ;;  %s1371_s15 = smov 128  }
 0x90c   :  { %1169 = dma.vmem_to_hbm [thread:$0]  %s1162_s3, 256, %s1164_s24, [#allocation6], %s1371_s15, %s1371_s15, %s1366_s20  }
 0x90d   :  { %v944_v16 = vsel %vm943_vm11, %v1300_v18, %v940_v28 }
 0x90e   :  { %v955_v30 = vmul.f32 %v944_v16, %v921_v63 }
 0x910   :  { %v960_v32 = vmul.f32 %v1259_v29, %v955_v30 }
 0x912   :  { %v965_v33 = vadd.f32 %v1260_v31, %v960_v32 }
 0x914   :  { %1234 = vmatmul.msk.f32.vlgmr.msra.gmra.mxu2 %vm75_vm0, %v965_v33 }
 0x962   :  { %v911_v37 = vpop.xlane.xlu0 %910 }
 0x963   :  { %v920_v38 = vmul.f32 %v1723_v60, %v911_v37 }
 0x965   :  { %v922_v39 = vsub.f32 %v903_v11, %v920_v38 }
 0x967   :  { %v924_v40 = vmul.f32 %v922_v39, %v922_v39 }
 0x969   :  { %v928_v42 = vsel %vm75_vm0, %v924_v40, 0.0 }
 0x96a   :  { %929 = vadd.xlane.f32.xlu2 %v928_v42 }
 0x997   :  { %v1026_v14 = vpop.f32.mrf.mxu2 }
 0x998   :  { %v1027_v41 = vadd.f32 %v1261_v44, %v1026_v14 }
 0x99a   :  { %v1032_v45 = vmax.f32 %v1027_v41, 0.0 }
 0x99c   :  { %1240 = vmatmul.msk.f32.vlgmr.msra.gmra.mxu0 %vm1042_vm12, %v1032_v45 }
 0x9dd   :  { %v930_v46 = vpop.xlane.xlu2 %929 }
 0x9de   :  { %v932_v47 = vmul.f32 %v930_v46, %v1723_v60 }
 0x9e0   :  { %v934_v48 = vadd.f32 1e-05, %v932_v47 }
 0x9e2   :  { %1301 = vrsqrt.f32 %v934_v48  ;;  %vm951_vm14 = vweird.f32 %v934_v48 }
 0x9e8   :  { %v1302_v49 = vpop.eup %1301 }
 0x9e9   :  { %v946_v50 = vmul.f32 %v1302_v49, %v934_v48  ;;  %vm952_vm13 = vweird.f32 %v1302_v49 }
 0x9ea   :  { %vm953_vm15 = vmor %vm951_vm14, %vm952_vm13 }
 0x9eb   :  { %v947_v22 = vmul.f32 %v1302_v49, %v946_v50 }
 0x9ed   :  { %v948_v51 = vmul.f32 0.5, %v947_v22 }
 0x9ef   :  { %v949_v52 = vsub.f32 1.5, %v948_v51 }
 0x9f1   :  { %v950_v53 = vmul.f32 %v1302_v49, %v949_v52 }
 0x9f3   :  { %v954_v54 = vsel %vm953_vm15, %v1302_v49, %v950_v53 }
 0x9f4   :  { %v956_v55 = vmul.f32 %v954_v54, %v922_v39 }
 0x9f6   :  { %v961_v24 = vmul.f32 %v1259_v29, %v956_v55 }
 0x9f8   :  { %v966_v26 = vadd.f32 %v1260_v31, %v961_v24 }
 0x9fa   :  { %1235 = vmatmul.msk.f32.gmra.mxu2 %vm75_vm0, %v966_v26 }
 0xa19   :  { %v1078_v57 = vpop.f32.mrf.mxu0 }
 0xa1a   :  { %v1079_v7 = vadd.f32 %v1262_v56, %v1078_v57 }
 0xa1c   :  { %v1084_v58 = vadd.f32 %v1079_v7, %v965_v33 }
 0xa1e   :  { %v1088_v59 = vsel %vm75_vm0, %v1084_v58, 0.0 }
 0xa1f   :  { %1089 = vadd.xlane.f32.xlu0 %v1088_v59 }
 0xa7d   :  { %v1029_v61 = vpop.f32.mrf.mxu2 }
 0xa7e   :  { %v1030_v62 = vadd.f32 %v1261_v44, %v1029_v61 }
 0xa80   :  { %v1033_v63 = vmax.f32 %v1030_v62, 0.0 }
 0xa82   :  { %1241 = vmatmul.msk.f32.gmra.mxu0 %vm1042_vm12, %v1033_v63 }
 0xa92   :  { %v1090_v0 = vpop.xlane.xlu0 %1089 }
 0xa93   :  { %v1094_v1 = vmul.f32 %v1090_v0, %v1723_v60 }
 0xa95   :  { %v1096_v2 = vsub.f32 %v1084_v58, %v1094_v1 }
 0xa97   :  { %v1098_v3 = vmul.f32 %v1096_v2, %v1096_v2 }
 0xa99   :  { %v1100_v4 = vsel %vm75_vm0, %v1098_v3, 0.0 }
 0xa9a   :  { %1101 = vadd.xlane.f32.xlu2 %v1100_v4 }
 0xaff   :  { %v1081_v5 = vpop.f32.mrf.mxu0 }
 0xb00   :  { %v1082_v6 = vadd.f32 %v1262_v56, %v1081_v5 }
 0xb02   :  { %v1085_v8 = vadd.f32 %v1082_v6, %v966_v26 }
 0xb04   :  { %v1091_v9 = vsel %vm75_vm0, %v1085_v8, 0.0 }
 0xb05   :  { %1092 = vadd.xlane.f32.xlu1 %v1091_v9 }
 0xb0d   :  { %v1102_v10 = vpop.xlane.xlu2 %1101 }
 0xb0e   :  { %v1106_v11 = vmul.f32 %v1102_v10, %v1723_v60 }
 0xb10   :  { %v1108_v12 = vadd.f32 1e-05, %v1106_v11 }
 0xb12   :  { %1303 = vrsqrt.f32 %v1108_v12  ;;  %vm1116_vm3 = vweird.f32 %v1108_v12 }
 0xb18   :  { %v1304_v13 = vpop.eup %1303 }
 0xb19   :  { %v1111_v15 = vmul.f32 %v1304_v13, %v1108_v12  ;;  %vm1117_vm2 = vweird.f32 %v1304_v13 }
 0xb1a   :  { %vm1118_vm4 = vmor %vm1116_vm3, %vm1117_vm2 }
 0xb1b   :  { %v1112_v17 = vmul.f32 %v1304_v13, %v1111_v15 }
 0xb1d   :  { %v1113_v19 = vmul.f32 0.5, %v1112_v17 }
 0xb1f   :  { %v1114_v20 = vsub.f32 1.5, %v1113_v19 }
 0xb21   :  { %v1115_v18 = vmul.f32 %v1304_v13, %v1114_v20 }
 0xb23   :  { %v1119_v23 = vsel %vm1118_vm4, %v1304_v13, %v1115_v18 }
 0xb24   :  { %v1130_v25 = vmul.f32 %v1119_v23, %v1096_v2 }
 0xb26   :  { %v1135_v28 = vmul.f32 %v1263_v21, %v1130_v25 }
 0xb28   :  { %v1140_v29 = vadd.f32 %v1264_v27, %v1135_v28 }
 0xb2a   :  { %1142 = vst.msk [vmem:[#allocation3] sm:$0xff] %vm75_vm0, %v1140_v29 }
 0xb78   :  { %v1093_v16 = vpop.xlane.xlu1 %1092 }
 0xb79   :  { %v1095_v30 = vmul.f32 %v1093_v16, %v1723_v60 }
 0xb7b   :  { %v1097_v31 = vsub.f32 %v1085_v8, %v1095_v30 }
 0xb7d   :  { %v1099_v32 = vmul.f32 %v1097_v31, %v1097_v31 }
 0xb7f   :  { %v1103_v33 = vsel %vm75_vm0, %v1099_v32, 0.0 }
 0xb80   :  { %1104 = vadd.xlane.f32.xlu0 %v1103_v33 }
 0xbf3   :  { %v1105_v34 = vpop.xlane.xlu0 %1104 }
 0xbf4   :  { %v1107_v35 = vmul.f32 %v1105_v34, %v1723_v60 }
 0xbf6   :  { %v1109_v36 = vadd.f32 1e-05, %v1107_v35 }
 0xbf8   :  { %1305 = vrsqrt.f32 %v1109_v36  ;;  %vm1126_vm6 = vweird.f32 %v1109_v36 }
 0xbfe   :  { %v1306_v37 = vpop.eup %1305 }
 0xbff   :  { %v1121_v38 = vmul.f32 %v1306_v37, %v1109_v36  ;;  %vm1127_vm5 = vweird.f32 %v1306_v37 }
 0xc00   :  { %vm1128_vm7 = vmor %vm1126_vm6, %vm1127_vm5 }
 0xc01   :  { %v1122_v39 = vmul.f32 %v1306_v37, %v1121_v38 }
 0xc03   :  { %v1123_v40 = vmul.f32 0.5, %v1122_v39 }
 0xc05   :  { %v1124_v42 = vsub.f32 1.5, %v1123_v40 }
 0xc07   :  { %v1125_v43 = vmul.f32 %v1306_v37, %v1124_v42 }
 0xc09   :  { %v1129_v44 = vsel %vm1128_vm7, %v1306_v37, %v1125_v43 }
 0xc0a   :  { %v1131_v14 = vmul.f32 %v1129_v44, %v1097_v31 }
 0xc0c   :  { %v1136_v60 = vmul.f32 %v1263_v21, %v1131_v14 }
 0xc0e   :  { %v1141_v41 = vadd.f32 %v1264_v27, %v1136_v60 }
 0xc10   :  { %1143 = vst.msk [vmem:[#allocation3 + $0x8] sm:$0xff] %vm75_vm0, %v1141_v41 }
 0xc11   :  { %1156 = dma.vmem_to_hbm [thread:$0]  %s1149_s26, 256, %s1151_s4, [#allocation4], %s1371_s15, %s1371_s15, %s1366_s20  }
 0xc12   :  { %1355 = dma.done.wait [#allocation4], 256  }
 0xc13   :  { %1356 = vsyncadd [#allocation4], 4294967040 }
 0xc14   :  { %1357 = dma.done.wait [#allocation6], 256  }
 0xc15   :  { %1358 = vsyncadd [#allocation6], 4294967040 }
 0xc16   :  { %1178 = vsyncpa [#allocation4], 1 }
 0xc17   :  { %1179 = vsyncpa [#allocation6], 1 }

</bundles_post_ra>
